<compile_context>
chip_gen: v5e
topology: v5e:2x2
jax: 0.10.0
libtpu: 0.0.40
codegen_flags: <defaults>
</compile_context>

<pallas_src>
import jax
import jax.numpy as jnp
from jax.experimental import pallas as pl
from jax.experimental.pallas import tpu as pltpu


def mlp_kernel(x_ref, w1_ref, b1_ref, w2_ref, b2_ref, w3_ref, b3_ref, o_ref):
    # x arrives as f32; cast to bf16 in-kernel (feeds the MXU, f32 accumulate).
    x = x_ref[...].astype(jnp.bfloat16)                               # (TB, F)

    # fc1 + ReLU  (bias add + ReLU in f32)
    h1 = jnp.dot(x, w1_ref[...], preferred_element_type=jnp.float32) + b1_ref[...]
    h1 = jnp.maximum(h1, 0.0).astype(jnp.bfloat16)
    # dropout -> identity (eval mode)

    # fc2 + ReLU
    h2 = jnp.dot(h1, w2_ref[...], preferred_element_type=jnp.float32) + b2_ref[...]
    h2 = jnp.maximum(h2, 0.0).astype(jnp.bfloat16)
    # dropout -> identity (eval mode)

    # fc3 (padded classes have zero weight cols and -1e30 bias)
    logits = jnp.dot(h2, w3_ref[...], preferred_element_type=jnp.float32) + b3_ref[...]

    # LogSoftmax over the class axis, numerically stable, all in f32.
    m = jnp.max(logits, axis=-1, keepdims=True)
    shifted = logits - m
    lse = jnp.log(jnp.sum(jnp.exp(shifted), axis=-1, keepdims=True))
    o_ref[...] = (shifted - lse).astype(o_ref.dtype)


def _round_up(n, m):
    return ((n + m - 1) // m) * m


def prepare_params(w1, b1, w2, b2, w3, b3):
    """One-time pad + cast of parameters (hoisted out of the per-call forward).

    Weights are stored (in_features, out_features); biases (1, out_features).
    """
    num_features = w1.shape[0]
    num_classes = w3.shape[1]

    # hidden_1: 412 -> 512 zero pad (exact math: relu(0)=0, zero w2 rows).
    h1p = _round_up(w1.shape[1], 128)
    p1 = h1p - w1.shape[1]
    if p1:
        w1 = jnp.pad(w1, ((0, 0), (0, p1)))
        b1 = jnp.pad(b1, ((0, 0), (0, p1)))
        w2 = jnp.pad(w2, ((0, p1), (0, 0)))

    # classes: 10 -> 128; zero w3 columns, -1e30 bias so padded logits vanish
    # in the logsumexp (exp(-1e30 - m) == 0 in f32).
    ncp = _round_up(num_classes, 128)
    pc = ncp - num_classes
    if pc:
        w3 = jnp.pad(w3, ((0, 0), (0, pc)))
        b3 = jnp.pad(b3, ((0, 0), (0, pc)), constant_values=-1e30)

    return dict(
        w1=w1.astype(jnp.bfloat16), b1=b1.astype(jnp.float32),
        w2=w2.astype(jnp.bfloat16), b2=b2.astype(jnp.float32),
        w3=w3.astype(jnp.bfloat16), b3=b3.astype(jnp.float32),
        num_features=num_features, num_classes=num_classes,
    )


def mlp_forward(x, params, *, batch_tile=1024):
    """x: (B, num_features) or anything flattenable to it (e.g. (B,1,28,28)).

    `params` must come from prepare_params(). Returns f32 log-probabilities of
    shape (B, num_classes).
    """
    w1, b1 = params["w1"], params["b1"]
    w2, b2 = params["w2"], params["b2"]
    w3, b3 = params["w3"], params["b3"]
    num_features = params["num_features"]
    num_classes = params["num_classes"]
    ncp = w3.shape[1]            # padded class dim (128)
    h1p = w1.shape[1]
    h2p = w2.shape[1]

    # x streamed as f32; bf16 cast happens inside the kernel.
    x2d = x.reshape(-1, num_features)
    if x2d.dtype != jnp.float32:
        x2d = x2d.astype(jnp.float32)

    # --- batch tiling: multiple of 8 sublanes; keep >=2 grid programs when
    #     possible so both v7x TensorCores get work. ---
    B = x2d.shape[0]
    b8 = _round_up(B, 8)
    tb_cap = max(8, _round_up((b8 + 1) // 2, 8))
    tb = min(batch_tile, tb_cap)
    b_pad = _round_up(b8, tb)
    if b_pad != B:
        x2d = jnp.pad(x2d, ((0, b_pad - B), (0, 0)))
    grid = (b_pad // tb,)

    # Constant-index full blocks: weights/biases stay resident in VMEM.
    full = lambda arr: pl.BlockSpec(arr.shape, lambda i: (0, 0))

    flops = 2 * b_pad * (num_features * h1p + h1p * h2p + h2p * ncp)
    bytes_accessed = (
        x2d.size * 4
        + (w1.size + w2.size + w3.size) * 2
        + (b1.size + b2.size + b3.size) * 4
        + b_pad * ncp * 4
    )
    cost = pl.CostEstimate(
        flops=flops,
        transcendentals=b_pad * (ncp + 1),   # exp per class + log per row
        bytes_accessed=bytes_accessed,
    )

    out = pl.pallas_call(
        mlp_kernel,
        out_shape=jax.ShapeDtypeStruct((b_pad, ncp), jnp.float32),
        grid=grid,
        in_specs=[
            pl.BlockSpec((tb, num_features), lambda i: (i, 0)),  # x tile
            full(w1), full(b1),
            full(w2), full(b2),
            full(w3), full(b3),
        ],
        out_specs=pl.BlockSpec((tb, ncp), lambda i: (i, 0)),
        compiler_params=pltpu.CompilerParams(dimension_semantics=("parallel",)),
        cost_estimate=cost,
    )(x2d, w1, b1, w2, b2, w3, b3)

    return out[:B, :num_classes]


def init_params(key, num_features=784, h1=412, h2=512, num_classes=10):
    """Deterministic init. Weights stored as (in, out); biases as (1, out)."""
    ks = jax.random.split(key, 6)

    def linear(kw, kb, fan_in, fan_out):
        # mimic PyTorch's uniform(-1/sqrt(fan_in), 1/sqrt(fan_in)) init
        bound = 1.0 / jnp.sqrt(jnp.float32(fan_in))
        w = jax.random.uniform(kw, (fan_in, fan_out), jnp.float32, -bound, bound)
        b = jax.random.uniform(kb, (1, fan_out), jnp.float32, -bound, bound)
        return w, b

    w1, b1 = linear(ks[0], ks[1], num_features, h1)
    w2, b2 = linear(ks[2], ks[3], h1, h2)
    w3, b3 = linear(ks[4], ks[5], h2, num_classes)
    return w1, b1, w2, b2, w3, b3


if __name__ == "__main__":
    key = jax.random.PRNGKey(0)
    k_x, k_p = jax.random.split(key)

    # MNIST-like input: batch of 8 images, 1x28x28 -> flattened to 784 inside.
    x = jax.random.normal(k_x, (8, 1, 28, 28), dtype=jnp.float32)
    raw_params = init_params(k_p)
    params = prepare_params(*raw_params)   # one-time pad + cast (hoisted)

    out = mlp_forward(x, params)
    out = jax.block_until_ready(out)

    # sanity: log-softmax rows should exp-sum to 1 (softmax math is done in f32;
    # the 118 padded classes contribute exp(-1e30) == 0).
    row_sums = jnp.sum(jnp.exp(out), axis=1)
    assert out.shape == (8, 10)
    assert bool(jnp.all(jnp.abs(row_sums - 1.0) < 1e-3))

    print("KERNEL_OK")
</pallas_src>

<mosaic_0001>
module attributes {stable_mosaic.version = 11 : i64} {
  func.func @mlp_kernel(%arg0: i32, %arg1: memref<8x784xf32, #tpu.memory_space<vmem>>, %arg2: memref<784x512xbf16, #tpu.memory_space<vmem>>, %arg3: memref<1x512xf32, #tpu.memory_space<vmem>>, %arg4: memref<512x512xbf16, #tpu.memory_space<vmem>>, %arg5: memref<1x512xf32, #tpu.memory_space<vmem>>, %arg6: memref<512x128xbf16, #tpu.memory_space<vmem>>, %arg7: memref<1x128xf32, #tpu.memory_space<vmem>>, %arg8: memref<8x128xf32, #tpu.memory_space<vmem>>) attributes {dimension_semantics = [#tpu.dimension_semantics<parallel>], iteration_bounds = array<i64: 1>, scalar_prefetch = 0 : i64, scratch_operands = 0 : i64, tpu.core_type = #tpu.core_type<tc>, window_params = [{transform_indices = @transform_0, window_bounds = array<i64: 8, 784>}, {pipeline_mode = #tpu.pipeline_mode<synchronous>, transform_indices = @transform_1, window_bounds = array<i64: 784, 512>}, {pipeline_mode = #tpu.pipeline_mode<synchronous>, transform_indices = @transform_2, window_bounds = array<i64: 1, 512>}, {pipeline_mode = #tpu.pipeline_mode<synchronous>, transform_indices = @transform_3, window_bounds = array<i64: 512, 512>}, {pipeline_mode = #tpu.pipeline_mode<synchronous>, transform_indices = @transform_4, window_bounds = array<i64: 1, 512>}, {pipeline_mode = #tpu.pipeline_mode<synchronous>, transform_indices = @transform_5, window_bounds = array<i64: 512, 128>}, {pipeline_mode = #tpu.pipeline_mode<synchronous>, transform_indices = @transform_6, window_bounds = array<i64: 1, 128>}, {transform_indices = @transform_7, window_bounds = array<i64: 8, 128>}]} {
    %c0 = arith.constant 0 : index
    %c0_0 = arith.constant 0 : index
    %0 = vector.load %arg1[%c0, %c0_0] : memref<8x784xf32, #tpu.memory_space<vmem>>, vector<8x784xf32>
    %1 = arith.truncf %0 : vector<8x784xf32> to vector<8x784xbf16>
    %c0_1 = arith.constant 0 : index
    %c0_2 = arith.constant 0 : index
    %2 = vector.load %arg2[%c0_1, %c0_2] : memref<784x512xbf16, #tpu.memory_space<vmem>>, vector<784x512xbf16>
    %cst = arith.constant dense<0.000000e+00> : vector<8x512xf32>
    %3 = tpu.matmul %1, %2, %cst {dimension_numbers = #tpu.dot_dimension_numbers<[1], [0], [0], [1], [0, 0, 1, 1], [], []>} : vector<8x784xbf16>, vector<784x512xbf16>, vector<8x512xf32> -> vector<8x512xf32>
    %c0_3 = arith.constant 0 : index
    %c0_4 = arith.constant 0 : index
    %4 = vector.load %arg3[%c0_3, %c0_4] : memref<1x512xf32, #tpu.memory_space<vmem>>, vector<1x512xf32>
    %5 = vector.broadcast %4 : vector<1x512xf32> to vector<8x512xf32>
    %6 = arith.addf %3, %5 : vector<8x512xf32>
    %cst_5 = arith.constant 0.000000e+00 : f32
    %7 = vector.broadcast %cst_5 : f32 to vector<8x512xf32>
    %8 = arith.maximumf %6, %7 : vector<8x512xf32>
    %9 = arith.truncf %8 : vector<8x512xf32> to vector<8x512xbf16>
    %c0_6 = arith.constant 0 : index
    %c0_7 = arith.constant 0 : index
    %10 = vector.load %arg4[%c0_6, %c0_7] : memref<512x512xbf16, #tpu.memory_space<vmem>>, vector<512x512xbf16>
    %cst_8 = arith.constant dense<0.000000e+00> : vector<8x512xf32>
    %11 = tpu.matmul %9, %10, %cst_8 {dimension_numbers = #tpu.dot_dimension_numbers<[1], [0], [0], [1], [0, 0, 1, 1], [], []>} : vector<8x512xbf16>, vector<512x512xbf16>, vector<8x512xf32> -> vector<8x512xf32>
    %c0_9 = arith.constant 0 : index
    %c0_10 = arith.constant 0 : index
    %12 = vector.load %arg5[%c0_9, %c0_10] : memref<1x512xf32, #tpu.memory_space<vmem>>, vector<1x512xf32>
    %13 = vector.broadcast %12 : vector<1x512xf32> to vector<8x512xf32>
    %14 = arith.addf %11, %13 : vector<8x512xf32>
    %cst_11 = arith.constant 0.000000e+00 : f32
    %15 = vector.broadcast %cst_11 : f32 to vector<8x512xf32>
    %16 = arith.maximumf %14, %15 : vector<8x512xf32>
    %17 = arith.truncf %16 : vector<8x512xf32> to vector<8x512xbf16>
    %c0_12 = arith.constant 0 : index
    %c0_13 = arith.constant 0 : index
    %18 = vector.load %arg6[%c0_12, %c0_13] : memref<512x128xbf16, #tpu.memory_space<vmem>>, vector<512x128xbf16>
    %cst_14 = arith.constant dense<0.000000e+00> : vector<8x128xf32>
    %19 = tpu.matmul %17, %18, %cst_14 {dimension_numbers = #tpu.dot_dimension_numbers<[1], [0], [0], [1], [0, 0, 1, 1], [], []>} : vector<8x512xbf16>, vector<512x128xbf16>, vector<8x128xf32> -> vector<8x128xf32>
    %c0_15 = arith.constant 0 : index
    %c0_16 = arith.constant 0 : index
    %20 = vector.load %arg7[%c0_15, %c0_16] : memref<1x128xf32, #tpu.memory_space<vmem>>, vector<1x128xf32>
    %21 = vector.broadcast %20 : vector<1x128xf32> to vector<8x128xf32>
    %22 = arith.addf %19, %21 : vector<8x128xf32>
    %cst_17 = arith.constant dense<0xFF800000> : vector<8xf32>
    %23 = vector.multi_reduction <maximumf>, %22, %cst_17 [1] : vector<8x128xf32> to vector<8xf32>
    %24 = vector.shape_cast %23 : vector<8xf32> to vector<8x1xf32>
    %25 = vector.broadcast %24 : vector<8x1xf32> to vector<8x128xf32>
    %26 = arith.subf %22, %25 : vector<8x128xf32>
    %27 = math.exp %26 : vector<8x128xf32>
    %cst_18 = arith.constant dense<0.000000e+00> : vector<8xf32>
    %28 = vector.multi_reduction <add>, %27, %cst_18 [1] : vector<8x128xf32> to vector<8xf32>
    %29 = vector.shape_cast %28 : vector<8xf32> to vector<8x1xf32>
    %30 = math.log %29 : vector<8x1xf32>
    %31 = vector.broadcast %30 : vector<8x1xf32> to vector<8x128xf32>
    %32 = arith.subf %26, %31 : vector<8x128xf32>
    %c0_19 = arith.constant 0 : index
    %c0_20 = arith.constant 0 : index
    %33 = vector.load %arg8[%c0_19, %c0_20] : memref<8x128xf32, #tpu.memory_space<vmem>>, vector<8x128xf32>
    tpu.vector_store %arg8[%c0_19, %c0_20], %32 {strides = array<i32>} : memref<8x128xf32, #tpu.memory_space<vmem>>, vector<8x128xf32>,
    return
  }
  func.func @transform_0(%arg0: i32) -> (i32, i32) {
    %c0_i32 = arith.constant 0 : i32
    %c0_i32_0 = arith.constant 0 : i32
    return %arg0, %c0_i32 : i32, i32
  }
  func.func @transform_1(%arg0: i32) -> (i32, i32) {
    %c0_i32 = arith.constant 0 : i32
    %c0_i32_0 = arith.constant 0 : i32
    %c0_i32_1 = arith.constant 0 : i32
    return %c0_i32, %c0_i32_0 : i32, i32
  }
  func.func @transform_2(%arg0: i32) -> (i32, i32) {
    %c0_i32 = arith.constant 0 : i32
    %c0_i32_0 = arith.constant 0 : i32
    %c0_i32_1 = arith.constant 0 : i32
    return %c0_i32, %c0_i32_0 : i32, i32
  }
  func.func @transform_3(%arg0: i32) -> (i32, i32) {
    %c0_i32 = arith.constant 0 : i32
    %c0_i32_0 = arith.constant 0 : i32
    %c0_i32_1 = arith.constant 0 : i32
    return %c0_i32, %c0_i32_0 : i32, i32
  }
  func.func @transform_4(%arg0: i32) -> (i32, i32) {
    %c0_i32 = arith.constant 0 : i32
    %c0_i32_0 = arith.constant 0 : i32
    %c0_i32_1 = arith.constant 0 : i32
    return %c0_i32, %c0_i32_0 : i32, i32
  }
  func.func @transform_5(%arg0: i32) -> (i32, i32) {
    %c0_i32 = arith.constant 0 : i32
    %c0_i32_0 = arith.constant 0 : i32
    %c0_i32_1 = arith.constant 0 : i32
    return %c0_i32, %c0_i32_0 : i32, i32
  }
  func.func @transform_6(%arg0: i32) -> (i32, i32) {
    %c0_i32 = arith.constant 0 : i32
    %c0_i32_0 = arith.constant 0 : i32
    %c0_i32_1 = arith.constant 0 : i32
    return %c0_i32, %c0_i32_0 : i32, i32
  }
  func.func @transform_7(%arg0: i32) -> (i32, i32) {
    %c0_i32 = arith.constant 0 : i32
    %c0_i32_0 = arith.constant 0 : i32
    return %arg0, %c0_i32 : i32, i32
  }
}

</mosaic_0001>

<bundles_post_ra>
// kernel: tpu_custom_call.1
= control target key start
LH: loop header
LB: loop body
LE: loop exit
PB: predicated region body
PF: predicated region fallthrough
CT: control target
= control target key end

     0   :  { %12 = vsyncpa [#allocation3], 0  ;;  %s5215_s0 = inlined_call_operand.hbm [shape: f32[8,784], index: 0, kind: input, shape index: {}]   ;;  %s5216_s1 = inlined_call_operand.hbm [shape: bf16[784,512], index: 1, kind: input, shape index: {}]   ;;  %s5217_s2 = inlined_call_operand.hbm [shape: f32[1,512], index: 2, kind: input, shape index: {}]   ;;  %s5218_s3 = inlined_call_operand.hbm [shape: bf16[512,512], index: 3, kind: input, shape index: {}]   ;;  %s5219_s4 = inlined_call_operand.hbm [shape: f32[1,512], index: 4, kind: input, shape index: {}]   ;;  %s5220_s5 = inlined_call_operand.hbm [shape: bf16[512,128], index: 5, kind: input, shape index: {}]   ;;  %s5221_s6 = inlined_call_operand.vmem [shape: f32[1,128], index: 6, kind: input, shape index: {}]   ;;  %s5222_s7 = inlined_call_operand.hbm [shape: f32[8,128], index: 7, kind: output, shape index: {}]  }
   0x1   :  { %13 = vsyncpa [#allocation6], 0 }
   0x2   :  { %14 = vsyncpa [#allocation9], 0 }
   0x3   :  { %15 = vsyncpa [#allocation12], 0  ;;  %s32_s26 = sshll.u32 %s5216_s1, 4  ;;  %s33_s26 = int_to_ptr.hbm [resolvable:$true] %s32_s26 }
   0x4   :  { %16 = vsyncpa [#allocation4], 0  ;;  %s5007_s27 = smov [#allocation5]   ;;  %s56_s8 = sshll.u32 %s5218_s3, 4  ;;  %s57_s8 = int_to_ptr.hbm [resolvable:$true] %s56_s8 }
   0x5   :  { %s34_s28 = sshll.u32 %s5007_s27, 4  ;;  %s5008_s9 = smov 256   ;;  %s35_s28 = int_to_ptr.vmem [resolvable:$true] %s34_s28 }
   0x6   :  { %s5009_s10 = smov 16   ;;  %s5010_s11 = smov [#allocation8]  }
   0x7   :  { %40 = dma.hbm_to_vmem [thread:$0]  %s33_s26, 25088, %s35_s28, [#allocation6], %s5008_s9, %s5008_s9, %s5009_s10  }
   0x8   :  { %s58_s12 = sshll.u32 %s5010_s11, 4  ;;  %s22_s15 = sshll.u32 %s5215_s0, 4  ;;  %s59_s12 = int_to_ptr.vmem [resolvable:$true] %s58_s12  ;;  %s23_s15 = int_to_ptr.hbm [resolvable:$true] %s22_s15 }
   0x9   :  { %64 = dma.hbm_to_vmem [thread:$0]  %s57_s8, 16384, %s59_s12, [#allocation9], %s5008_s9, %s5008_s9, %s5009_s10  }
   0xa   :  { %s46_s17 = sshll.u32 %s5217_s2, 4  ;;  %s5011_s18 = smov [#allocation2]   ;;  %s47_s17 = int_to_ptr.hbm [resolvable:$true] %s46_s17 }
   0xb   :  { %s24_s19 = sshll.u32 %s5011_s18, 4  ;;  %s5012_s3 = smov [#allocation7]   ;;  %s25_s19 = int_to_ptr.vmem [resolvable:$true] %s24_s19 }
   0xc   :  { %27 = dma.hbm_to_vmem [thread:$0]  %s23_s15, 896, %s25_s19, [#allocation3]  }
   0xd   :  { %s48_s20 = sshll.u32 %s5012_s3, 4  ;;  %s70_s23 = sshll.u32 %s5219_s4, 4  ;;  %s49_s20 = int_to_ptr.vmem [resolvable:$true] %s48_s20  ;;  %s71_s23 = int_to_ptr.hbm [resolvable:$true] %s70_s23 }
   0xe   :  { %51 = dma.hbm_to_vmem [thread:$0]  %s47_s17, 64, %s49_s20, [#allocation6]  }
   0xf   :  { %s80_s25 = sshll.u32 %s5220_s5, 4  ;;  %s5013_s26 = smov [#allocation10]   ;;  %s81_s25 = int_to_ptr.hbm [resolvable:$true] %s80_s25 }
  0x10   :  { %s72_s2 = sshll.u32 %s5013_s26, 4  ;;  %s5014_s27 = smov [#allocation11]   ;;  %s73_s2 = int_to_ptr.vmem [resolvable:$true] %s72_s2 }
  0x11   :  { %75 = dma.hbm_to_vmem [thread:$0]  %s71_s23, 64, %s73_s2, [#allocation9]  }
  0x12   :  { %s82_s28 = sshll.u32 %s5014_s27, 4  ;;  %s5015_s29 = smov 64   ;;  %s83_s28 = int_to_ptr.vmem [resolvable:$true] %s82_s28 }
  0x13   :  { %s5016_s30 = smov 4  }
  0x14   :  { %88 = dma.hbm_to_vmem [thread:$0]  %s81_s25, 4096, %s83_s28, [#allocation12], %s5015_s29, %s5015_s29, %s5016_s30  }
  0x15   :  { %4997 = dma.done.wait [#allocation3], 896  }
  0x16   :  { %4998 = vsyncadd [#allocation3], 4294966400 }
  0x17   :  { %4999 = dma.done.wait [#allocation6], 25152  }
  0x18   :  { %5000 = vsyncadd [#allocation6], 4294942144 }
  0x19   :  { %5001 = dma.done.wait [#allocation9], 16448  }
  0x1a   :  { %5002 = vsyncadd [#allocation9], 4294950848 }
  0x1b   :  { %5003 = dma.done.wait [#allocation12], 4096  }
  0x1c   :  { %5004 = vsyncadd [#allocation12], 4294963200  ;;  %v3143_v0 = vld [vmem:[#allocation5 + $0xe0] sm:$0xf]  ;;  %v4487_v1 = vld [vmem:[#allocation5 + $0xec] sm:$0xf0] }
  0x1d   :  { %v3271_v2 = vld [vmem:[#allocation5 + $0x1e0] sm:$0xf]  ;;  %v3144_v3 = vor.u32 %v4487_v1, %v3143_v0  ;;  %v4519_v4 = vld [vmem:[#allocation5 + $0x1ec] sm:$0xf0]  ;;  %vm1316_vm0 = vcmask 130048   ;;  %s5017_s8 = smov [#allocation13]  }
  0x1e   :  { %v3399_v5 = vld [vmem:[#allocation5 + $0x2e0] sm:$0xf]  ;;  %v4551_v6 = vld [vmem:[#allocation5 + $0x2ec] sm:$0xf0]  ;;  %v3272_v7 = vor.u32 %v4519_v4, %v3271_v2  ;;  %s3014_s9 = sshll.u32 %s5017_s8, 4  ;;  %s3016_s11 = sshll.u32 %s5222_s7, 4  ;;  %s3015_s9 = int_to_ptr.vmem [resolvable:$true] %s3014_s9  ;;  %s3017_s11 = int_to_ptr.hbm [resolvable:$true] %s3016_s11 }
  0x1f   :  { %v3400_v8 = vor.u32 %v4551_v6, %v3399_v5  ;;  %v3527_v9 = vld [vmem:[#allocation5 + $0x3e0] sm:$0xf]  ;;  %v4583_v10 = vld [vmem:[#allocation5 + $0x3ec] sm:$0xf0]  ;;  %1320 = vmatpush.bf16.msra.mxu0 %v3144_v3 }
  0x20   :  { %v3127_v11 = vld [vmem:[#allocation5 + $0xc0] sm:$0xf]  ;;  %v3528_v12 = vor.u32 %v4583_v10, %v3527_v9  ;;  %v4483_v13 = vld [vmem:[#allocation5 + $0xcc] sm:$0xf0]  ;;  %1333 = vmatpush.bf16.msra.mxu1 %v3272_v7 }
  0x21   :  { %v3255_v14 = vld [vmem:[#allocation5 + $0x1c0] sm:$0xf]  ;;  %v4515_v15 = vld [vmem:[#allocation5 + $0x1cc] sm:$0xf0]  ;;  %1346 = vmatpush.bf16.msra.mxu2 %v3400_v8  ;;  %v3128_v16 = vor.u32 %v4483_v13, %v3127_v11 }
  0x22   :  { %v3256_v17 = vor.u32 %v4515_v15, %v3255_v14  ;;  %v3383_v18 = vld [vmem:[#allocation5 + $0x2c0] sm:$0xf]  ;;  %v4547_v19 = vld [vmem:[#allocation5 + $0x2cc] sm:$0xf0]  ;;  %1359 = vmatpush.bf16.msra.mxu3 %v3528_v12 }
  0x23   :  { %v3511_v20 = vld [vmem:[#allocation5 + $0x3c0] sm:$0xf]  ;;  %v3384_v21 = vor.u32 %v4547_v19, %v3383_v18  ;;  %v4579_v22 = vld [vmem:[#allocation5 + $0x3cc] sm:$0xf0]  ;;  %1321 = vmatpush.bf16.msra.mxu0 %v3128_v16 }
  0x24   :  { %v3111_v23 = vld [vmem:[#allocation5 + $0xa0] sm:$0xf]  ;;  %v4479_v24 = vld [vmem:[#allocation5 + $0xac] sm:$0xf0]  ;;  %v3512_v25 = vor.u32 %v4579_v22, %v3511_v20  ;;  %1334 = vmatpush.bf16.msra.mxu1 %v3256_v17 }
  0x25   :  { %v3239_v26 = vld [vmem:[#allocation5 + $0x1a0] sm:$0xf]  ;;  %v4511_v27 = vld [vmem:[#allocation5 + $0x1ac] sm:$0xf0]  ;;  %v3112_v29 = vor.u32 %v4479_v24, %v3111_v23  ;;  %1347 = vmatpush.bf16.msra.mxu2 %v3384_v21 }
  0x26   :  { %v3367_v28 = vld [vmem:[#allocation5 + $0x2a0] sm:$0xf]  ;;  %v4543_v30 = vld [vmem:[#allocation5 + $0x2ac] sm:$0xf0]  ;;  %v3240_v33 = vor.u32 %v4511_v27, %v3239_v26  ;;  %1360 = vmatpush.bf16.msra.mxu3 %v3512_v25 }
  0x27   :  { %v3495_v31 = vld [vmem:[#allocation5 + $0x3a0] sm:$0xf]  ;;  %v4575_v32 = vld [vmem:[#allocation5 + $0x3ac] sm:$0xf0]  ;;  %v3368_v34 = vor.u32 %v4543_v30, %v3367_v28  ;;  %1322 = vmatpush.bf16.msra.mxu0 %v3112_v29 }
  0x28   :  { %v3095_v35 = vld [vmem:[#allocation5 + $0x80] sm:$0xf]  ;;  %v4475_v36 = vld [vmem:[#allocation5 + $0x8c] sm:$0xf0]  ;;  %v3496_v38 = vor.u32 %v4575_v32, %v3495_v31  ;;  %1335 = vmatpush.bf16.msra.mxu1 %v3240_v33  ;;  %v4485_v33 = vld [vmem:[#allocation5 + $0xe4] sm:$0xf] }
  0x29   :  { %v3223_v37 = vld [vmem:[#allocation5 + $0x180] sm:$0xf]  ;;  %v4507_v39 = vld [vmem:[#allocation5 + $0x18c] sm:$0xf0]  ;;  %v3096_v44 = vor.u32 %v4475_v36, %v3095_v35  ;;  %1348 = vmatpush.bf16.msra.mxu2 %v3368_v34  ;;  %v3145_v34 = vld [vmem:[#allocation5 + $0xf0] sm:$0xf0] }
  0x2a   :  { %v3351_v40 = vld [vmem:[#allocation5 + $0x280] sm:$0xf]  ;;  %v4539_v41 = vld [vmem:[#allocation5 + $0x28c] sm:$0xf0]  ;;  %v3224_v45 = vor.u32 %v4507_v39, %v3223_v37  ;;  %1361 = vmatpush.bf16.msra.mxu3 %v3496_v38  ;;  %v118_v35 = vld [vmem:[#allocation2 + $0x10] sm:$0xff] }
  0x2b   :  { %v3479_v42 = vld [vmem:[#allocation5 + $0x380] sm:$0xf]  ;;  %v4571_v43 = vld [vmem:[#allocation5 + $0x38c] sm:$0xf0]  ;;  %v3352_v46 = vor.u32 %v4539_v41, %v3351_v40  ;;  %1323 = vmatpush.bf16.msra.mxu0 %v3096_v44  ;;  %v116_v40 = vld [vmem:[#allocation2] sm:$0xff] }
  0x2c   :  { %v3079_v47 = vld [vmem:[#allocation5 + $0x60] sm:$0xf]  ;;  %v4471_v48 = vld [vmem:[#allocation5 + $0x6c] sm:$0xf0]  ;;  %v3480_v50 = vor.u32 %v4571_v43, %v3479_v42  ;;  %1336 = vmatpush.bf16.msra.mxu1 %v3224_v45  ;;  %v4517_v43 = vld [vmem:[#allocation5 + $0x1e4] sm:$0xf] }
  0x2d   :  { %v3207_v49 = vld [vmem:[#allocation5 + $0x160] sm:$0xf]  ;;  %v4503_v51 = vld [vmem:[#allocation5 + $0x16c] sm:$0xf0]  ;;  %v3080_v56 = vor.u32 %v4471_v48, %v3079_v47  ;;  %1349 = vmatpush.bf16.msra.mxu2 %v3352_v46  ;;  %v3273_v44 = vld [vmem:[#allocation5 + $0x1f0] sm:$0xf0]  ;;  %v3148_v47 = vor.u32 %v4485_v33, %v3145_v34 }
  0x2e   :  { %v3335_v52 = vld [vmem:[#allocation5 + $0x260] sm:$0xf]  ;;  %v4535_v53 = vld [vmem:[#allocation5 + $0x26c] sm:$0xf0]  ;;  %v3208_v57 = vor.u32 %v4503_v51, %v3207_v49  ;;  %1362 = vmatpush.bf16.msra.mxu3 %v3480_v50  ;;  %v5076_v51 = vpack.c.bf16 %v118_v35, %v118_v35  ;;  %v4501_v35 = vld [vmem:[#allocation5 + $0x164] sm:$0xf] }
  0x2f   :  { %v3463_v54 = vld [vmem:[#allocation5 + $0x360] sm:$0xf]  ;;  %v4567_v55 = vld [vmem:[#allocation5 + $0x36c] sm:$0xf0]  ;;  %v3336_v58 = vor.u32 %v4535_v53, %v3335_v52  ;;  %1324 = vmatpush.bf16.msra.mxu0 %v3080_v56  ;;  %v4481_v53 = vld [vmem:[#allocation5 + $0xc4] sm:$0xf] }
  0x30   :  { %v3063_v59 = vld [vmem:[#allocation5 + $0x40] sm:$0xf]  ;;  %v4467_v60 = vld [vmem:[#allocation5 + $0x4c] sm:$0xf0]  ;;  %v3464_v62 = vor.u32 %v4567_v55, %v3463_v54  ;;  %1337 = vmatpush.bf16.msra.mxu1 %v3208_v57  ;;  %v3129_v54 = vld [vmem:[#allocation5 + $0xd0] sm:$0xf0]  ;;  %v5078_v55 = vpack.c.bf16 %v116_v40, %v116_v40 }
  0x31   :  { %v3191_v61 = vld [vmem:[#allocation5 + $0x140] sm:$0xf]  ;;  %v4499_v63 = vld [vmem:[#allocation5 + $0x14c] sm:$0xf0]  ;;  %v3064_v4 = vor.u32 %v4467_v60, %v3063_v59  ;;  %1350 = vmatpush.bf16.msra.mxu2 %v3336_v58  ;;  %v3276_v59 = vor.u32 %v4517_v43, %v3273_v44  ;;  %v4465_v43 = vld [vmem:[#allocation5 + $0x44] sm:$0xf] }
  0x32   :  { %v3319_v0 = vld [vmem:[#allocation5 + $0x240] sm:$0xf]  ;;  %v4531_v1 = vld [vmem:[#allocation5 + $0x24c] sm:$0xf0]  ;;  %v3192_v5 = vor.u32 %v4499_v63, %v3191_v61  ;;  %1363 = vmatpush.bf16.msra.mxu3 %v3464_v62  ;;  %v4513_v61 = vld [vmem:[#allocation5 + $0x1c4] sm:$0xf] }
  0x33   :  { %v3447_v2 = vld [vmem:[#allocation5 + $0x340] sm:$0xf]  ;;  %v4563_v3 = vld [vmem:[#allocation5 + $0x34c] sm:$0xf0]  ;;  %v3320_v6 = vor.u32 %v4531_v1, %v3319_v0  ;;  %1325 = vmatpush.bf16.msra.mxu0 %v3064_v4  ;;  %v3257_v62 = vld [vmem:[#allocation5 + $0x1d0] sm:$0xf0]  ;;  %v3132_v0 = vor.u32 %v4481_v53, %v3129_v54 }
  0x34   :  { %v3047_v7 = vld [vmem:[#allocation5 + $0x20] sm:$0xf]  ;;  %v4463_v8 = vld [vmem:[#allocation5 + $0x2c] sm:$0xf0]  ;;  %v3448_v10 = vor.u32 %v4563_v3, %v3447_v2  ;;  %1338 = vmatpush.bf16.msra.mxu1 %v3192_v5  ;;  %v4477_v5 = vld [vmem:[#allocation5 + $0xa4] sm:$0xf] }
  0x35   :  { %v3175_v9 = vld [vmem:[#allocation5 + $0x120] sm:$0xf]  ;;  %v4495_v11 = vld [vmem:[#allocation5 + $0x12c] sm:$0xf0]  ;;  %v3048_v16 = vor.u32 %v4463_v8, %v3047_v7  ;;  %1351 = vmatpush.bf16.msra.mxu2 %v3320_v6  ;;  %v3113_v6 = vld [vmem:[#allocation5 + $0xb0] sm:$0xf0]  ;;  %v3260_v8 = vor.u32 %v4513_v61, %v3257_v62 }
  0x36   :  { %v3303_v12 = vld [vmem:[#allocation5 + $0x220] sm:$0xf]  ;;  %v4527_v13 = vld [vmem:[#allocation5 + $0x22c] sm:$0xf0]  ;;  %v3176_v20 = vor.u32 %v4495_v11, %v3175_v9  ;;  %1364 = vmatpush.bf16.msra.mxu3 %v3448_v10  ;;  %v4509_v10 = vld [vmem:[#allocation5 + $0x1a4] sm:$0xf] }
  0x37   :  { %v3431_v14 = vld [vmem:[#allocation5 + $0x320] sm:$0xf]  ;;  %v4559_v15 = vld [vmem:[#allocation5 + $0x32c] sm:$0xf0]  ;;  %v3304_v21 = vor.u32 %v4527_v13, %v3303_v12  ;;  %1326 = vmatpush.bf16.msra.mxu0 %v3048_v16  ;;  %v3241_v11 = vld [vmem:[#allocation5 + $0x1b0] sm:$0xf0]  ;;  %v3116_v13 = vor.u32 %v4477_v5, %v3113_v6 }
  0x38   :  { %v3031_v17 = vld [vmem:[#allocation5] sm:$0xf]  ;;  %v4459_v18 = vld [vmem:[#allocation5 + $0xc] sm:$0xf0]  ;;  %v3432_v25 = vor.u32 %v4559_v15, %v3431_v14  ;;  %1339 = vmatpush.bf16.msra.mxu1 %v3176_v20  ;;  %v3244_v20 = vor.u32 %v4509_v10, %v3241_v11  ;;  %v3065_v44 = vld [vmem:[#allocation5 + $0x50] sm:$0xf0] }
  0x39   :  { %v3159_v19 = vld [vmem:[#allocation5 + $0x100] sm:$0xf]  ;;  %v4491_v22 = vld [vmem:[#allocation5 + $0x10c] sm:$0xf0]  ;;  %v3032_v32 = vor.u32 %v4459_v18, %v3031_v17  ;;  %1352 = vmatpush.bf16.msra.mxu2 %v3304_v21  ;;  %v4473_v18 = vld [vmem:[#allocation5 + $0x84] sm:$0xf] }
  0x3a   :  { %v3287_v23 = vld [vmem:[#allocation5 + $0x200] sm:$0xf]  ;;  %v4523_v24 = vld [vmem:[#allocation5 + $0x20c] sm:$0xf0]  ;;  %v3160_v36 = vor.u32 %v4491_v22, %v3159_v19  ;;  %1365 = vmatpush.bf16.msra.mxu3 %v3432_v25  ;;  %v3097_v19 = vld [vmem:[#allocation5 + $0x90] sm:$0xf0] }
  0x3b   :  { %v3415_v26 = vld [vmem:[#allocation5 + $0x300] sm:$0xf]  ;;  %v4555_v27 = vld [vmem:[#allocation5 + $0x30c] sm:$0xf0]  ;;  %v3288_v37 = vor.u32 %v4523_v24, %v3287_v23  ;;  %1327 = vmatpush.bf16.msra.mxu0 %v3032_v32  ;;  %v4505_v22 = vld [vmem:[#allocation5 + $0x184] sm:$0xf]  ;;  %v3100_v25 = vor.u32 %v4473_v18, %v3097_v19 }
  0x3c   :  { %v3655_v28 = vld [vmem:[#allocation5 + $0x4e0] sm:$0xf]  ;;  %v4615_v29 = vld [vmem:[#allocation5 + $0x4ec] sm:$0xf0]  ;;  %v3416_v41 = vor.u32 %v4555_v27, %v3415_v26  ;;  %1340 = vmatpush.bf16.msra.mxu1 %v3160_v36  ;;  %v3225_v23 = vld [vmem:[#allocation5 + $0x190] sm:$0xf0] }
  0x3d   :  { %v3783_v30 = vld [vmem:[#allocation5 + $0x5e0] sm:$0xf]  ;;  %v4647_v31 = vld [vmem:[#allocation5 + $0x5ec] sm:$0xf0]  ;;  %v3656_v42 = vor.u32 %v4615_v29, %v3655_v28  ;;  %1353 = vmatpush.bf16.msra.mxu2 %v3288_v37  ;;  %v122_v32 = vld [vmem:[#allocation2 + $0x30] sm:$0xff]  ;;  %v3228_v33 = vor.u32 %v4505_v22, %v3225_v23 }
  0x3e   :  { %v3799_v38 = vld [vmem:[#allocation5 + $0x600] sm:$0xf]  ;;  %v4651_v39 = vld [vmem:[#allocation5 + $0x60c] sm:$0xf0]  ;;  %v3784_v46 = vor.u32 %v4647_v31, %v3783_v30  ;;  %1366 = vmatpush.bf16.msra.mxu3 %v3416_v41  ;;  %1328 = vmatmul.bf16.vlgmr.msra.gmra.mxu0 %v5078_v55  ;;  %v4469_v30 = vld [vmem:[#allocation5 + $0x64] sm:$0xf] }
  0x3f   :  { %v119_v45 = vld [vmem:[#allocation2 + $0x18] sm:$0xff]  ;;  %v4611_v49 = vld [vmem:[#allocation5 + $0x4cc] sm:$0xf0]  ;;  %v3800_v56 = vor.u32 %v4651_v39, %v3799_v38  ;;  %1372 = vmatpush.bf16.msrb.mxu0 %v3656_v42  ;;  %v3081_v31 = vld [vmem:[#allocation5 + $0x70] sm:$0xf0] }
  0x40   :  { %v3639_v48 = vld [vmem:[#allocation5 + $0x4c0] sm:$0xf]  ;;  %v4643_v52 = vld [vmem:[#allocation5 + $0x5cc] sm:$0xf0]  ;;  %v5080_v57 = vpack.c.bf16 %v119_v45, %v119_v45  ;;  %1385 = vmatpush.bf16.msrb.mxu1 %v3784_v46  ;;  %1354 = vmatmul.bf16.vlgmr.msra.gmra.mxu2 %v5076_v51  ;;  %v3209_v36 = vld [vmem:[#allocation5 + $0x170] sm:$0xf0]  ;;  %v3084_v38 = vor.u32 %v4469_v30, %v3081_v31  ;;  %v5088_v45 = vpack.c.bf16 %v122_v32, %v122_v32 }
  0x41   :  { %v3767_v50 = vld [vmem:[#allocation5 + $0x5c0] sm:$0xf]  ;;  %v117_v58 = vld [vmem:[#allocation2 + $0x8] sm:$0xff]  ;;  %v3640_v60 = vor.u32 %v4611_v49, %v3639_v48  ;;  %1405 = vmatpush.bf16.msrb.mxu2 %v3800_v56  ;;  %v3212_v46 = vor.u32 %v4501_v35, %v3209_v36  ;;  %v4497_v48 = vld [vmem:[#allocation5 + $0x144] sm:$0xf] }
  0x42   :  { %1411 = vmatpush.bf16.msrb.mxu3 %v3148_v47  ;;  %v3768_v63 = vor.u32 %v4643_v52, %v3767_v50  ;;  %v3623_v1 = vld [vmem:[#allocation5 + $0x4a0] sm:$0xf]  ;;  %v4607_v2 = vld [vmem:[#allocation5 + $0x4ac] sm:$0xf0]  ;;  %v5084_v7 = vpack.c.bf16 %v117_v58, %v117_v58  ;;  %v3193_v49 = vld [vmem:[#allocation5 + $0x150] sm:$0xf0]  ;;  %v3068_v52 = vor.u32 %v4465_v43, %v3065_v44 }
  0x43   :  { %v3751_v3 = vld [vmem:[#allocation5 + $0x5a0] sm:$0xf]  ;;  %v4639_v4 = vld [vmem:[#allocation5 + $0x5ac] sm:$0xf0]  ;;  %1367 = vmatmul.bf16.vlgmr.msra.gmra.mxu3 %v5080_v57  ;;  %1373 = vmatpush.bf16.msrb.mxu0 %v3640_v60  ;;  %v3624_v9 = vor.u32 %v4607_v2, %v3623_v1  ;;  %v3049_v60 = vld [vmem:[#allocation5 + $0x30] sm:$0xf0]  ;;  %v3196_v61 = vor.u32 %v4497_v48, %v3193_v49 }
  0x44   :  { %1386 = vmatpush.bf16.msrb.mxu1 %v3768_v63  ;;  %v3752_v12 = vor.u32 %v4639_v4, %v3751_v3  ;;  %v3607_v14 = vld [vmem:[#allocation5 + $0x480] sm:$0xf]  ;;  %v4603_v15 = vld [vmem:[#allocation5 + $0x48c] sm:$0xf0]  ;;  %v4493_v63 = vld [vmem:[#allocation5 + $0x124] sm:$0xf] }
  0x45   :  { %1424 = vmatpush.bf16.msra.mxu2 %v3276_v59  ;;  %v3735_v16 = vld [vmem:[#allocation5 + $0x580] sm:$0xf]  ;;  %1341 = vmatmul.bf16.vlgmr.msra.gmra.mxu1 %v5084_v7  ;;  %v4635_v17 = vld [vmem:[#allocation5 + $0x58c] sm:$0xf0]  ;;  %v3608_v21 = vor.u32 %v4603_v15, %v3607_v14  ;;  %v4461_v59 = vld [vmem:[#allocation5 + $0x24] sm:$0xf] }
  0x46   :  { %1412 = vmatpush.bf16.msrb.mxu3 %v3132_v0  ;;  %v3736_v24 = vor.u32 %v4635_v17, %v3735_v16  ;;  %v3591_v26 = vld [vmem:[#allocation5 + $0x460] sm:$0xf]  ;;  %v4599_v27 = vld [vmem:[#allocation5 + $0x46c] sm:$0xf0]  ;;  %v3177_v0 = vld [vmem:[#allocation5 + $0x130] sm:$0xf0]  ;;  %v3052_v3 = vor.u32 %v4461_v59, %v3049_v60 }
  0x47   :  { %1374 = vmatpush.bf16.msrb.mxu0 %v3624_v9  ;;  %v3719_v28 = vld [vmem:[#allocation5 + $0x560] sm:$0xf]  ;;  %v4631_v29 = vld [vmem:[#allocation5 + $0x56c] sm:$0xf0]  ;;  %v3592_v34 = vor.u32 %v4599_v27, %v3591_v26  ;;  %v3033_v9 = vld [vmem:[#allocation5 + $0x10] sm:$0xf0]  ;;  %v3180_v14 = vor.u32 %v4493_v63, %v3177_v0 }
  0x48   :  { %1387 = vmatpush.bf16.msrb.mxu1 %v3752_v12  ;;  %v3720_v37 = vor.u32 %v4631_v29, %v3719_v28  ;;  %v3575_v39 = vld [vmem:[#allocation5 + $0x440] sm:$0xf]  ;;  %v4595_v40 = vld [vmem:[#allocation5 + $0x44c] sm:$0xf0]  ;;  %v4549_v10 = vld [vmem:[#allocation5 + $0x2e4] sm:$0xf] }
  0x49   :  { %1425 = vmatpush.bf16.msra.mxu2 %v3260_v8  ;;  %v3703_v41 = vld [vmem:[#allocation5 + $0x540] sm:$0xf]  ;;  %v4627_v42 = vld [vmem:[#allocation5 + $0x54c] sm:$0xf0]  ;;  %v3576_v47 = vor.u32 %v4595_v40, %v3575_v39  ;;  %v4457_v8 = vld [vmem:[#allocation5 + $0x4] sm:$0xf] }
  0x4a   :  { %1413 = vmatpush.bf16.msrb.mxu3 %v3116_v13  ;;  %v3704_v50 = vor.u32 %v4627_v42, %v3703_v41  ;;  %v3559_v53 = vld [vmem:[#allocation5 + $0x420] sm:$0xf]  ;;  %v4591_v54 = vld [vmem:[#allocation5 + $0x42c] sm:$0xf0]  ;;  %v3401_v11 = vld [vmem:[#allocation5 + $0x2f0] sm:$0xf0] }
  0x4b   :  { %1375 = vmatpush.bf16.msrb.mxu0 %v3608_v21  ;;  %v3687_v56 = vld [vmem:[#allocation5 + $0x520] sm:$0xf]  ;;  %v4623_v58 = vld [vmem:[#allocation5 + $0x52c] sm:$0xf0]  ;;  %v3560_v62 = vor.u32 %v4591_v54, %v3559_v53  ;;  %v4581_v12 = vld [vmem:[#allocation5 + $0x3e4] sm:$0xf] }
  0x4c   :  { %1388 = vmatpush.bf16.msrb.mxu1 %v3736_v24  ;;  %v3543_v1 = vld [vmem:[#allocation5 + $0x400] sm:$0xf]  ;;  %v3688_v2 = vor.u32 %v4623_v58, %v3687_v56  ;;  %v4587_v4 = vld [vmem:[#allocation5 + $0x40c] sm:$0xf0]  ;;  %v3529_v13 = vld [vmem:[#allocation5 + $0x3f0] sm:$0xf0]  ;;  %v3404_v24 = vor.u32 %v4549_v10, %v3401_v11 }
  0x4d   :  { %1426 = vmatpush.bf16.msra.mxu2 %v3244_v20  ;;  %v3671_v5 = vld [vmem:[#allocation5 + $0x500] sm:$0xf]  ;;  %v4619_v6 = vld [vmem:[#allocation5 + $0x50c] sm:$0xf0]  ;;  %v3544_v15 = vor.u32 %v4587_v4, %v3543_v1  ;;  %v4613_v16 = vld [vmem:[#allocation5 + $0x4e4] sm:$0xf]  ;;  %v3036_v20 = vor.u32 %v4457_v8, %v3033_v9 }
  0x4e   :  { %1414 = vmatpush.bf16.msrb.mxu3 %v3100_v25  ;;  %v3657_v17 = vld [vmem:[#allocation5 + $0x4f0] sm:$0xf0]  ;;  %v120_v18 = vld [vmem:[#allocation2 + $0x20] sm:$0xff]  ;;  %v3672_v19 = vor.u32 %v4619_v6, %v3671_v5  ;;  %v4489_v21 = vld [vmem:[#allocation5 + $0x104] sm:$0xf]  ;;  %v3532_v25 = vor.u32 %v4581_v12, %v3529_v13 }
  0x4f   :  { %1376 = vmatpush.bf16.msrb.mxu0 %v3592_v34  ;;  %v3161_v22 = vld [vmem:[#allocation5 + $0x110] sm:$0xf0]  ;;  %v4645_v26 = vld [vmem:[#allocation5 + $0x5e4] sm:$0xf]  ;;  %v3660_v29 = vor.u32 %v4613_v16, %v3657_v17  ;;  %v5092_v30 = vpack.c.bf16 %v120_v18, %v120_v18 }
  0x50   :  { %1389 = vmatpush.bf16.msrb.mxu1 %v3720_v37  ;;  %3813 = vmatmul.msk.bf16.vlgmr.msrb.gmra.mxu2 %vm1316_vm0, %v5088_v45  ;;  %v121_v23 = vld [vmem:[#allocation2 + $0x28] sm:$0xff]  ;;  %v4545_v28 = vld [vmem:[#allocation5 + $0x2c4] sm:$0xf]  ;;  %v3164_v34 = vor.u32 %v4489_v21, %v3161_v22 }
  0x51   :  { %1427 = vmatpush.bf16.msra.mxu2 %v3228_v33  ;;  %v3785_v27 = vld [vmem:[#allocation5 + $0x5f0] sm:$0xf0]  ;;  %v4577_v32 = vld [vmem:[#allocation5 + $0x3c4] sm:$0xf]  ;;  %v5094_v35 = vpack.c.bf16 %v121_v23, %v121_v23 }
  0x52   :  { %1415 = vmatpush.bf16.msrb.mxu3 %v3084_v38  ;;  %v3385_v31 = vld [vmem:[#allocation5 + $0x2d0] sm:$0xf0]  ;;  %v4609_v36 = vld [vmem:[#allocation5 + $0x4c4] sm:$0xf]  ;;  %v3788_v38 = vor.u32 %v4645_v26, %v3785_v27 }
  0x53   :  { %1377 = vmatpush.bf16.msrb.mxu0 %v3576_v47  ;;  %v3513_v33 = vld [vmem:[#allocation5 + $0x3d0] sm:$0xf0]  ;;  %v3388_v39 = vor.u32 %v4545_v28, %v3385_v31  ;;  %v4641_v41 = vld [vmem:[#allocation5 + $0x5c4] sm:$0xf] }
  0x54   :  { %1390 = vmatpush.bf16.msrb.mxu1 %v3704_v50  ;;  %v3641_v37 = vld [vmem:[#allocation5 + $0x4d0] sm:$0xf0]  ;;  %v3516_v40 = vor.u32 %v4577_v32, %v3513_v33  ;;  %v4541_v43 = vld [vmem:[#allocation5 + $0x2a4] sm:$0xf] }
  0x55   :  { %1428 = vmatpush.bf16.msra.mxu2 %v3212_v46  ;;  %v3769_v42 = vld [vmem:[#allocation5 + $0x5d0] sm:$0xf0]  ;;  %v3644_v44 = vor.u32 %v4609_v36, %v3641_v37  ;;  %v4573_v47 = vld [vmem:[#allocation5 + $0x3a4] sm:$0xf] }
  0x56   :  { %1416 = vmatpush.bf16.msrb.mxu3 %v3068_v52  ;;  %v3369_v46 = vld [vmem:[#allocation5 + $0x2b0] sm:$0xf0]  ;;  %v4605_v49 = vld [vmem:[#allocation5 + $0x4a4] sm:$0xf]  ;;  %v3772_v52 = vor.u32 %v4641_v41, %v3769_v42 }
  0x57   :  { %1378 = vmatpush.bf16.msrb.mxu0 %v3560_v62  ;;  %v3497_v48 = vld [vmem:[#allocation5 + $0x3b0] sm:$0xf0]  ;;  %v3372_v53 = vor.u32 %v4541_v43, %v3369_v46  ;;  %v4637_v56 = vld [vmem:[#allocation5 + $0x5a4] sm:$0xf] }
  0x58   :  { %1391 = vmatpush.bf16.msrb.mxu1 %v3688_v2  ;;  %v3625_v50 = vld [vmem:[#allocation5 + $0x4b0] sm:$0xf0]  ;;  %v3500_v54 = vor.u32 %v4573_v47, %v3497_v48  ;;  %v4537_v59 = vld [vmem:[#allocation5 + $0x284] sm:$0xf] }
  0x59   :  { %1429 = vmatpush.bf16.msra.mxu2 %v3196_v61  ;;  %v3753_v58 = vld [vmem:[#allocation5 + $0x5b0] sm:$0xf0]  ;;  %v3628_v60 = vor.u32 %v4605_v49, %v3625_v50  ;;  %v4569_v62 = vld [vmem:[#allocation5 + $0x384] sm:$0xf] }
  0x5a   :  { %1417 = vmatpush.bf16.msrb.mxu3 %v3052_v3  ;;  %v3353_v61 = vld [vmem:[#allocation5 + $0x290] sm:$0xf0]  ;;  %v4601_v0 = vld [vmem:[#allocation5 + $0x484] sm:$0xf]  ;;  %v3756_v2 = vor.u32 %v4637_v56, %v3753_v58  ;;  %v3151_v56 = vld [vmem:[#allocation5 + $0xe8] sm:$0xf] }
  0x5b   :  { %1379 = vmatpush.bf16.msrb.mxu0 %v3544_v15  ;;  %v3481_v63 = vld [vmem:[#allocation5 + $0x390] sm:$0xf0]  ;;  %v3356_v3 = vor.u32 %v4537_v59, %v3353_v61  ;;  %v4633_v5 = vld [vmem:[#allocation5 + $0x584] sm:$0xf]  ;;  %v4488_v58 = vld [vmem:[#allocation5 + $0xf4] sm:$0xf0] }
  0x5c   :  { %1392 = vmatpush.bf16.msrb.mxu1 %v3672_v19  ;;  %v3609_v1 = vld [vmem:[#allocation5 + $0x490] sm:$0xf0]  ;;  %v3484_v4 = vor.u32 %v4569_v62, %v3481_v63  ;;  %v4533_v8 = vld [vmem:[#allocation5 + $0x264] sm:$0xf]  ;;  %v3407_v62 = vld [vmem:[#allocation5 + $0x2e8] sm:$0xf] }
  0x5d   :  { %1430 = vmatpush.bf16.msra.mxu2 %v3180_v14  ;;  %v3737_v6 = vld [vmem:[#allocation5 + $0x590] sm:$0xf0]  ;;  %v3612_v9 = vor.u32 %v4601_v0, %v3609_v1  ;;  %v4565_v11 = vld [vmem:[#allocation5 + $0x364] sm:$0xf]  ;;  %v4552_v63 = vld [vmem:[#allocation5 + $0x2f4] sm:$0xf0] }
  0x5e   :  { %1418 = vmatpush.bf16.msrb.mxu3 %v3036_v20  ;;  %1380 = vmatmul.bf16.vlgmr.msrb.gmra.mxu0 %v5092_v30  ;;  %v3337_v10 = vld [vmem:[#allocation5 + $0x270] sm:$0xf0]  ;;  %v4597_v13 = vld [vmem:[#allocation5 + $0x464] sm:$0xf]  ;;  %v3740_v15 = vor.u32 %v4633_v5, %v3737_v6  ;;  %v3152_v5 = vor.u32 %v4488_v58, %v3151_v56  ;;  %v3535_v6 = vld [vmem:[#allocation5 + $0x3e8] sm:$0xf] }
  0x5f   :  { %1437 = vmatpush.bf16.msra.mxu0 %v3404_v24  ;;  %1393 = vmatmul.bf16.vlgmr.msrb.gmra.mxu1 %v5094_v35  ;;  %v3465_v12 = vld [vmem:[#allocation5 + $0x370] sm:$0xf0]  ;;  %v3340_v16 = vor.u32 %v4533_v8, %v3337_v10  ;;  %v4629_v18 = vld [vmem:[#allocation5 + $0x564] sm:$0xf]  ;;  %v4584_v8 = vld [vmem:[#allocation5 + $0x3f4] sm:$0xf0] }
  0x60   :  { %1450 = vmatpush.bf16.msra.mxu1 %v3532_v25  ;;  %v3593_v14 = vld [vmem:[#allocation5 + $0x470] sm:$0xf0]  ;;  %v3468_v17 = vor.u32 %v4565_v11, %v3465_v12  ;;  %v4529_v20 = vld [vmem:[#allocation5 + $0x244] sm:$0xf]  ;;  %v3279_v10 = vld [vmem:[#allocation5 + $0x1e8] sm:$0xf]  ;;  %v3408_v12 = vor.u32 %v4552_v63, %v3407_v62 }
  0x61   :  { %1431 = vmatpush.bf16.msra.mxu2 %v3164_v34  ;;  %1419 = vmatmul.bf16.vlgmr.msrb.gmra.mxu3 %v5078_v55  ;;  %v3721_v19 = vld [vmem:[#allocation5 + $0x570] sm:$0xf0]  ;;  %v3596_v21 = vor.u32 %v4597_v13, %v3593_v14  ;;  %v4561_v23 = vld [vmem:[#allocation5 + $0x344] sm:$0xf]  ;;  %v4520_v11 = vld [vmem:[#allocation5 + $0x1f4] sm:$0xf0] }
  0x62   :  { %1463 = vmatpush.bf16.msra.mxu3 %v3660_v29  ;;  %v3321_v22 = vld [vmem:[#allocation5 + $0x250] sm:$0xf0]  ;;  %v4593_v25 = vld [vmem:[#allocation5 + $0x444] sm:$0xf]  ;;  %v3724_v27 = vor.u32 %v4629_v18, %v3721_v19  ;;  %v3135_v14 = vld [vmem:[#allocation5 + $0xc8] sm:$0xf]  ;;  %v3280_v19 = vor.u32 %v4520_v11, %v3279_v10 }
  0x63   :  { %1438 = vmatpush.bf16.msra.mxu0 %v3388_v39  ;;  %v3449_v24 = vld [vmem:[#allocation5 + $0x350] sm:$0xf0]  ;;  %v3324_v28 = vor.u32 %v4529_v20, %v3321_v22  ;;  %v4625_v31 = vld [vmem:[#allocation5 + $0x544] sm:$0xf]  ;;  %v4548_v18 = vld [vmem:[#allocation5 + $0x2d4] sm:$0xf0] }
  0x64   :  { %1451 = vmatpush.bf16.msra.mxu1 %v3516_v40  ;;  %1432 = vmatmul.bf16.vlgmr.msra.gmra.mxu2 %v5084_v7  ;;  %v3577_v26 = vld [vmem:[#allocation5 + $0x450] sm:$0xf0]  ;;  %v3452_v29 = vor.u32 %v4561_v23, %v3449_v24  ;;  %v4525_v33 = vld [vmem:[#allocation5 + $0x224] sm:$0xf]  ;;  %v3519_v20 = vld [vmem:[#allocation5 + $0x3c8] sm:$0xf] }
  0x65   :  { %1476 = vmatpush.bf16.msrb.mxu2 %v3788_v38  ;;  %v3705_v32 = vld [vmem:[#allocation5 + $0x550] sm:$0xf0]  ;;  %v3580_v34 = vor.u32 %v4593_v25, %v3577_v26  ;;  %v4557_v37 = vld [vmem:[#allocation5 + $0x324] sm:$0xf]  ;;  %v3263_v23 = vld [vmem:[#allocation5 + $0x1c8] sm:$0xf] }
  0x66   :  { %1464 = vmatpush.bf16.msra.mxu3 %v3644_v44  ;;  %v3305_v36 = vld [vmem:[#allocation5 + $0x230] sm:$0xf0]  ;;  %v4589_v39 = vld [vmem:[#allocation5 + $0x424] sm:$0xf]  ;;  %v3708_v41 = vor.u32 %v4625_v31, %v3705_v32  ;;  %v4516_v24 = vld [vmem:[#allocation5 + $0x1d4] sm:$0xf0] }
  0x67   :  { %1439 = vmatpush.bf16.msra.mxu0 %v3372_v53  ;;  %v3433_v38 = vld [vmem:[#allocation5 + $0x330] sm:$0xf0]  ;;  %v4621_v42 = vld [vmem:[#allocation5 + $0x524] sm:$0xf]  ;;  %v3308_v46 = vor.u32 %v4525_v33, %v3305_v36  ;;  %v3119_v26 = vld [vmem:[#allocation5 + $0xa8] sm:$0xf]  ;;  %v3264_v32 = vor.u32 %v4516_v24, %v3263_v23 }
  0x68   :  { %1452 = vmatpush.bf16.msra.mxu1 %v3500_v54  ;;  %v3561_v40 = vld [vmem:[#allocation5 + $0x430] sm:$0xf0]  ;;  %v4521_v44 = vld [vmem:[#allocation5 + $0x204] sm:$0xf]  ;;  %v3436_v47 = vor.u32 %v4557_v37, %v3433_v38  ;;  %v4544_v31 = vld [vmem:[#allocation5 + $0x2b4] sm:$0xf0] }
  0x69   :  { %1477 = vmatpush.bf16.msrb.mxu2 %v3772_v52  ;;  %v3689_v43 = vld [vmem:[#allocation5 + $0x530] sm:$0xf0]  ;;  %v4553_v49 = vld [vmem:[#allocation5 + $0x304] sm:$0xf]  ;;  %v3564_v52 = vor.u32 %v4589_v39, %v3561_v40  ;;  %v3503_v33 = vld [vmem:[#allocation5 + $0x3a8] sm:$0xf] }
  0x6a   :  { %1465 = vmatpush.bf16.msra.mxu3 %v3628_v60  ;;  %v3289_v48 = vld [vmem:[#allocation5 + $0x210] sm:$0xf0]  ;;  %v4585_v53 = vld [vmem:[#allocation5 + $0x404] sm:$0xf]  ;;  %v3692_v60 = vor.u32 %v4621_v42, %v3689_v43  ;;  %v3247_v37 = vld [vmem:[#allocation5 + $0x1a8] sm:$0xf] }
  0x6b   :  { %1440 = vmatpush.bf16.msra.mxu0 %v3356_v3  ;;  %v3417_v50 = vld [vmem:[#allocation5 + $0x310] sm:$0xf0]  ;;  %v4649_v59 = vld [vmem:[#allocation5 + $0x604] sm:$0xf]  ;;  %v3292_v0 = vor.u32 %v4521_v44, %v3289_v48  ;;  %v4512_v38 = vld [vmem:[#allocation5 + $0x1b4] sm:$0xf0] }
  0x6c   :  { %1453 = vmatpush.bf16.msra.mxu1 %v3484_v4  ;;  %v3545_v54 = vld [vmem:[#allocation5 + $0x410] sm:$0xf0]  ;;  %v3420_v1 = vor.u32 %v4553_v49, %v3417_v50  ;;  %v3103_v40 = vld [vmem:[#allocation5 + $0x88] sm:$0xf]  ;;  %v4540_v44 = vld [vmem:[#allocation5 + $0x294] sm:$0xf0] }
  0x6d   :  { %1478 = vmatpush.bf16.msrb.mxu2 %v3756_v2  ;;  %v3801_v61 = vld [vmem:[#allocation5 + $0x610] sm:$0xf0]  ;;  %v4617_v2 = vld [vmem:[#allocation5 + $0x504] sm:$0xf]  ;;  %v3548_v4 = vor.u32 %v4585_v53, %v3545_v54  ;;  %v3359_v43 = vld [vmem:[#allocation5 + $0x288] sm:$0xf] }
  0x6e   :  { %1466 = vmatpush.bf16.msra.mxu3 %v3612_v9  ;;  %v3673_v3 = vld [vmem:[#allocation5 + $0x510] sm:$0xf0]  ;;  %v3804_v9 = vor.u32 %v4649_v59, %v3801_v61  ;;  %v4572_v48 = vld [vmem:[#allocation5 + $0x394] sm:$0xf0]  ;;  %v3231_v50 = vld [vmem:[#allocation5 + $0x188] sm:$0xf]  ;;  %v3360_v53 = vor.u32 %v4540_v44, %v3359_v43 }
  0x6f   :  { %1441 = vmatpush.bf16.msra.mxu0 %v3340_v16  ;;  %v3676_v13 = vor.u32 %v4617_v2, %v3673_v3  ;;  %v3536_v16 = vor.u32 %v4584_v8, %v3535_v6  ;;  %v3087_v54 = vld [vmem:[#allocation5 + $0x68] sm:$0xf]  ;;  %v4472_v56 = vld [vmem:[#allocation5 + $0x74] sm:$0xf0] }
  0x70   :  { %1454 = vmatpush.bf16.msra.mxu1 %v3468_v17  ;;  %v3391_v17 = vld [vmem:[#allocation5 + $0x2c8] sm:$0xf]  ;;  %v4568_v63 = vld [vmem:[#allocation5 + $0x374] sm:$0xf0] }
  0x71   :  { %1479 = vmatpush.bf16.msrb.mxu2 %v3740_v15  ;;  %v4484_v15 = vld [vmem:[#allocation5 + $0xd4] sm:$0xf0]  ;;  %v3392_v25 = vor.u32 %v4548_v18, %v3391_v17  ;;  %v3343_v59 = vld [vmem:[#allocation5 + $0x268] sm:$0xf] }
  0x72   :  { %1467 = vmatpush.bf16.msra.mxu3 %v3596_v21  ;;  %v4580_v21 = vld [vmem:[#allocation5 + $0x3d4] sm:$0xf0]  ;;  %v3136_v22 = vor.u32 %v4484_v15, %v3135_v14  ;;  %v3471_v62 = vld [vmem:[#allocation5 + $0x368] sm:$0xf] }
  0x73   :  { %1442 = vmatpush.bf16.msra.mxu0 %v3324_v28  ;;  %v3520_v28 = vor.u32 %v4580_v21, %v3519_v20  ;;  %v4504_v2 = vld [vmem:[#allocation5 + $0x174] sm:$0xf0]  ;;  %v3472_v6 = vor.u32 %v4568_v63, %v3471_v62  ;;  %v3327_v8 = vld [vmem:[#allocation5 + $0x248] sm:$0xf] }
  0x74   :  { %1455 = vmatpush.bf16.msra.mxu1 %v3452_v29  ;;  %v3375_v29 = vld [vmem:[#allocation5 + $0x2a8] sm:$0xf]  ;;  %v4500_v15 = vld [vmem:[#allocation5 + $0x154] sm:$0xf0] }
  0x75   :  { %1480 = vmatpush.bf16.msrb.mxu2 %v3724_v27  ;;  %v4480_v27 = vld [vmem:[#allocation5 + $0xb4] sm:$0xf0]  ;;  %v3376_v39 = vor.u32 %v4544_v31, %v3375_v29  ;;  %v3455_v11 = vld [vmem:[#allocation5 + $0x348] sm:$0xf] }
  0x76   :  { %1468 = vmatpush.bf16.msra.mxu3 %v3580_v34  ;;  %v4576_v34 = vld [vmem:[#allocation5 + $0x3b4] sm:$0xf0]  ;;  %v3120_v36 = vor.u32 %v4480_v27, %v3119_v26  ;;  %v3199_v14 = vld [vmem:[#allocation5 + $0x148] sm:$0xf] }
  0x77   :  { %1443 = vmatpush.bf16.msra.mxu0 %v3308_v46  ;;  %v3504_v42 = vor.u32 %v4576_v34, %v3503_v33  ;;  %v3248_v46 = vor.u32 %v4512_v38, %v3247_v37  ;;  %v3055_v17 = vld [vmem:[#allocation5 + $0x28] sm:$0xf]  ;;  %v4464_v18 = vld [vmem:[#allocation5 + $0x34] sm:$0xf0] }
  0x78   :  { %1456 = vmatpush.bf16.msra.mxu1 %v3436_v47  ;;  %v3487_v47 = vld [vmem:[#allocation5 + $0x388] sm:$0xf]  ;;  %v4528_v21 = vld [vmem:[#allocation5 + $0x234] sm:$0xf0] }
  0x79   :  { %1481 = vmatpush.bf16.msrb.mxu2 %v3708_v41  ;;  %v4476_v41 = vld [vmem:[#allocation5 + $0x94] sm:$0xf0]  ;;  %v3488_v58 = vor.u32 %v4572_v48, %v3487_v47  ;;  %v3311_v20 = vld [vmem:[#allocation5 + $0x228] sm:$0xf]  ;;  %v4486_v47 = vld [vmem:[#allocation5 + $0xec] sm:$0xf] }
  0x7a   :  { %1469 = vmatpush.bf16.msra.mxu3 %v3564_v52  ;;  %v3104_v49 = vor.u32 %v4476_v41, %v3103_v40  ;;  %v4508_v52 = vld [vmem:[#allocation5 + $0x194] sm:$0xf0]  ;;  %v3439_v23 = vld [vmem:[#allocation5 + $0x328] sm:$0xf]  ;;  %v3312_v29 = vor.u32 %v4528_v21, %v3311_v20  ;;  %v3153_v48 = vld [vmem:[#allocation5 + $0xf8] sm:$0xf0] }
  0x7b   :  { %1444 = vmatpush.bf16.msra.mxu0 %v3292_v0  ;;  %v3232_v61 = vor.u32 %v4508_v52, %v3231_v50  ;;  %v3088_v0 = vor.u32 %v4472_v56, %v3087_v54  ;;  %v4560_v24 = vld [vmem:[#allocation5 + $0x334] sm:$0xf0]  ;;  %v3183_v26 = vld [vmem:[#allocation5 + $0x128] sm:$0xf]  ;;  %v3156_v63 = vor.u32 %v4486_v47, %v3153_v48 }
  0x7c   :  { %1457 = vmatpush.bf16.msra.mxu1 %v3420_v1  ;;  %v3215_v1 = vld [vmem:[#allocation5 + $0x168] sm:$0xf]  ;;  %v4496_v27 = vld [vmem:[#allocation5 + $0x134] sm:$0xf0]  ;;  %v3440_v34 = vor.u32 %v4560_v24, %v3439_v23  ;;  %v3249_v23 = vld [vmem:[#allocation5 + $0x1b8] sm:$0xf0] }
  0x7d   :  { %1482 = vmatpush.bf16.msrb.mxu2 %v3692_v60  ;;  %v4536_v60 = vld [vmem:[#allocation5 + $0x274] sm:$0xf0]  ;;  %v3216_v10 = vor.u32 %v4504_v2, %v3215_v1  ;;  %v3295_v37 = vld [vmem:[#allocation5 + $0x208] sm:$0xf]  ;;  %v3184_v40 = vor.u32 %v4496_v27, %v3183_v26  ;;  %v4482_v1 = vld [vmem:[#allocation5 + $0xcc] sm:$0xf] }
  0x7e   :  { %1470 = vmatpush.bf16.msra.mxu3 %v3548_v4  ;;  %1445 = vmatmul.bf16.vlgmr.msra.gmra.mxu0 %v5076_v51  ;;  %v3344_v3 = vor.u32 %v4536_v60, %v3343_v59  ;;  %v3071_v4 = vld [vmem:[#allocation5 + $0x48] sm:$0xf]  ;;  %v4460_v31 = vld [vmem:[#allocation5 + $0x14] sm:$0xf0]  ;;  %v4518_v60 = vld [vmem:[#allocation5 + $0x1ec] sm:$0xf] }
  0x7f   :  { %1528 = vmatpush.bf16.msrb.mxu0 %v3408_v12  ;;  %1458 = vmatmul.bf16.vlgmr.msra.gmra.mxu1 %v5080_v57  ;;  %v4564_v12 = vld [vmem:[#allocation5 + $0x354] sm:$0xf0]  ;;  %v3791_v52 = vld [vmem:[#allocation5 + $0x5e8] sm:$0xf]  ;;  %v3137_v2 = vld [vmem:[#allocation5 + $0xd8] sm:$0xf0] }
  0x80   :  { %1502 = vmatpush.bf16.msrb.mxu1 %v3152_v5  ;;  %v4468_v5 = vld [vmem:[#allocation5 + $0x54] sm:$0xf0]  ;;  %v3647_v54 = vld [vmem:[#allocation5 + $0x4c8] sm:$0xf]  ;;  %v4474_v26 = vld [vmem:[#allocation5 + $0x8c] sm:$0xf] }
  0x81   :  { %1483 = vmatpush.bf16.msrb.mxu2 %v3676_v13  ;;  %1471 = vmatmul.bf16.vlgmr.msra.gmra.mxu3 %v5092_v30  ;;  %v3072_v13 = vor.u32 %v4468_v5, %v3071_v4  ;;  %v4616_v33 = vld [vmem:[#allocation5 + $0x4f4] sm:$0xf0]  ;;  %v3775_v5 = vld [vmem:[#allocation5 + $0x5c8] sm:$0xf]  ;;  %v3105_v27 = vld [vmem:[#allocation5 + $0x98] sm:$0xf0] }
  0x82   :  { %1496 = vmatpush.bf16.msrb.mxu3 %v3804_v9  ;;  %v4532_v9 = vld [vmem:[#allocation5 + $0x254] sm:$0xf0]  ;;  %v3615_v20 = vld [vmem:[#allocation5 + $0x488] sm:$0xf] }
  0x83   :  { %1529 = vmatpush.bf16.msrb.mxu0 %v3392_v25  ;;  %v3056_v25 = vor.u32 %v4464_v18, %v3055_v17  ;;  %v4524_v38 = vld [vmem:[#allocation5 + $0x214] sm:$0xf0]  ;;  %v3759_v18 = vld [vmem:[#allocation5 + $0x5a8] sm:$0xf] }
  0x84   :  { %1503 = vmatpush.bf16.msrb.mxu1 %v3136_v22  ;;  %1484 = vmatmul.bf16.vlgmr.msrb.gmra.mxu2 %v5094_v35  ;;  %v3200_v22 = vor.u32 %v4500_v15, %v3199_v14  ;;  %v4556_v41 = vld [vmem:[#allocation5 + $0x314] sm:$0xf0]  ;;  %v3296_v50 = vor.u32 %v4524_v38, %v3295_v37  ;;  %v4478_v14 = vld [vmem:[#allocation5 + $0xac] sm:$0xf]  ;;  %v3121_v15 = vld [vmem:[#allocation5 + $0xb8] sm:$0xf0]  ;;  %v3108_v38 = vor.u32 %v4474_v26, %v3105_v27 }
  0x85   :  { %1541 = vmatpush.bf16.msra.mxu2 %v3536_v16  ;;  %v3328_v16 = vor.u32 %v4532_v9, %v3327_v8  ;;  %v4652_v43 = vld [vmem:[#allocation5 + $0x614] sm:$0xf0]  ;;  %v3631_v8 = vld [vmem:[#allocation5 + $0x4a8] sm:$0xf]  ;;  %v3124_v24 = vor.u32 %v4478_v14, %v3121_v15  ;;  %v3233_v37 = vld [vmem:[#allocation5 + $0x198] sm:$0xf0] }
  0x86   :  { %1515 = vmatpush.bf16.msra.mxu3 %v3280_v19  ;;  %v3456_v19 = vor.u32 %v4564_v12, %v3455_v11  ;;  %v4608_v9 = vld [vmem:[#allocation5 + $0x4b4] sm:$0xf0]  ;;  %v3265_v11 = vld [vmem:[#allocation5 + $0x1d8] sm:$0xf0]  ;;  %v3140_v12 = vor.u32 %v4482_v1, %v3137_v2  ;;  %v3583_v47 = vld [vmem:[#allocation5 + $0x448] sm:$0xf] }
  0x87   :  { %1530 = vmatpush.bf16.msrb.mxu0 %v3376_v39  ;;  %v3423_v39 = vld [vmem:[#allocation5 + $0x308] sm:$0xf]  ;;  %v4604_v21 = vld [vmem:[#allocation5 + $0x494] sm:$0xf0]  ;;  %v3201_v1 = vld [vmem:[#allocation5 + $0x158] sm:$0xf0] }
  0x88   :  { %1504 = vmatpush.bf16.msrb.mxu1 %v3120_v36  ;;  %v3167_v36 = vld [vmem:[#allocation5 + $0x108] sm:$0xf]  ;;  %v3424_v56 = vor.u32 %v4556_v41, %v3423_v39  ;;  %v3089_v41 = vld [vmem:[#allocation5 + $0x78] sm:$0xf0]  ;;  %v4596_v48 = vld [vmem:[#allocation5 + $0x454] sm:$0xf0] }
  0x89   :  { %1542 = vmatpush.bf16.msra.mxu2 %v3520_v28  ;;  %v3039_v28 = vld [vmem:[#allocation5 + $0x8] sm:$0xf]  ;;  %v3185_v14 = vld [vmem:[#allocation5 + $0x138] sm:$0xf0] }
  0x8a   :  { %1516 = vmatpush.bf16.msra.mxu3 %v3264_v32  ;;  %v3663_v32 = vld [vmem:[#allocation5 + $0x4e8] sm:$0xf]  ;;  %v3040_v44 = vor.u32 %v4460_v31, %v3039_v28  ;;  %v3616_v28 = vor.u32 %v4604_v21, %v3615_v20  ;;  %v4458_v20 = vld [vmem:[#allocation5 + $0xc] sm:$0xf]  ;;  %v3041_v21 = vld [vmem:[#allocation5 + $0x18] sm:$0xf0] }
  0x8b   :  { %1531 = vmatpush.bf16.msrb.mxu0 %v3360_v53  ;;  %v4648_v53 = vld [vmem:[#allocation5 + $0x5f4] sm:$0xf0]  ;;  %v3743_v31 = vld [vmem:[#allocation5 + $0x588] sm:$0xf]  ;;  %v3537_v26 = vld [vmem:[#allocation5 + $0x3f8] sm:$0xf0] }
  0x8c   :  { %1505 = vmatpush.bf16.msrb.mxu1 %v3104_v49  ;;  %v3664_v49 = vor.u32 %v4616_v33, %v3663_v32  ;;  %v4636_v32 = vld [vmem:[#allocation5 + $0x594] sm:$0xf0]  ;;  %v3599_v33 = vld [vmem:[#allocation5 + $0x468] sm:$0xf] }
  0x8d   :  { %1543 = vmatpush.bf16.msra.mxu2 %v3504_v42  ;;  %v3807_v42 = vld [vmem:[#allocation5 + $0x608] sm:$0xf]  ;;  %v3744_v39 = vor.u32 %v4636_v32, %v3743_v31  ;;  %v4546_v31 = vld [vmem:[#allocation5 + $0x2cc] sm:$0xf]  ;;  %v3044_v32 = vor.u32 %v4458_v20, %v3041_v21 }
  0x8e   :  { %1517 = vmatpush.bf16.msra.mxu3 %v3248_v46  ;;  %v4492_v46 = vld [vmem:[#allocation5 + $0x114] sm:$0xf0]  ;;  %v3808_v59 = vor.u32 %v4652_v43, %v3807_v42  ;;  %v4566_v20 = vld [vmem:[#allocation5 + $0x36c] sm:$0xf] }
  0x8f   :  { %1532 = vmatpush.bf16.msrb.mxu0 %v3344_v3  ;;  %v3168_v62 = vor.u32 %v4492_v46, %v3167_v36  ;;  %v4506_v36 = vld [vmem:[#allocation5 + $0x18c] sm:$0xf]  ;;  %v4632_v46 = vld [vmem:[#allocation5 + $0x574] sm:$0xf0] }
  0x90   :  { %1506 = vmatpush.bf16.msrb.mxu1 %v3088_v0  ;;  %v3792_v0 = vor.u32 %v4648_v53, %v3791_v52  ;;  %v3236_v43 = vor.u32 %v4506_v36, %v3233_v37  ;;  %v3169_v36 = vld [vmem:[#allocation5 + $0x118] sm:$0xf0] }
  0x91   :  { %1544 = vmatpush.bf16.msra.mxu2 %v3488_v58  ;;  %3814 = vmatmul.msk.bf16.vlgmr.msrb.gmra.mxu3 %vm1316_vm0, %v5088_v45  ;;  %v4612_v58 = vld [vmem:[#allocation5 + $0x4d4] sm:$0xf0] }
  0x92   :  { %1518 = vmatpush.bf16.msra.mxu3 %v3232_v61  ;;  %v3281_v61 = vld [vmem:[#allocation5 + $0x1f8] sm:$0xf0]  ;;  %v3648_v3 = vor.u32 %v4612_v58, %v3647_v54  ;;  %v4466_v54 = vld [vmem:[#allocation5 + $0x4c] sm:$0xf]  ;;  %v3584_v58 = vor.u32 %v4596_v48, %v3583_v47 }
  0x93   :  { %1533 = vmatpush.bf16.msrb.mxu0 %v3328_v16  ;;  %v3284_v4 = vor.u32 %v4518_v60, %v3281_v61  ;;  %v3632_v16 = vor.u32 %v4608_v9, %v3631_v8  ;;  %v3711_v60 = vld [vmem:[#allocation5 + $0x548] sm:$0xf]  ;;  %v4628_v61 = vld [vmem:[#allocation5 + $0x554] sm:$0xf0]  ;;  %v4610_v47 = vld [vmem:[#allocation5 + $0x4cc] sm:$0xf] }
  0x94   :  { %1507 = vmatpush.bf16.msrb.mxu1 %v3072_v13  ;;  %v3695_v9 = vld [vmem:[#allocation5 + $0x528] sm:$0xf]  ;;  %v3649_v48 = vld [vmem:[#allocation5 + $0x4d8] sm:$0xf0] }
  0x95   :  { %1545 = vmatpush.bf16.msra.mxu2 %v3472_v6  ;;  %v4644_v6 = vld [vmem:[#allocation5 + $0x5d4] sm:$0xf0] }
  0x96   :  { %1519 = vmatpush.bf16.msra.mxu3 %v3216_v10  ;;  %v4514_v10 = vld [vmem:[#allocation5 + $0x1cc] sm:$0xf]  ;;  %v3776_v13 = vor.u32 %v4644_v6, %v3775_v5  ;;  %v3057_v5 = vld [vmem:[#allocation5 + $0x38] sm:$0xf0] }
  0x97   :  { %1534 = vmatpush.bf16.msrb.mxu0 %v3312_v29  ;;  %v3268_v17 = vor.u32 %v4514_v10, %v3265_v11  ;;  %v4624_v10 = vld [vmem:[#allocation5 + $0x534] sm:$0xf0]  ;;  %v3551_v11 = vld [vmem:[#allocation5 + $0x408] sm:$0xf] }
  0x98   :  { %1508 = vmatpush.bf16.msrb.mxu1 %v3056_v25 }
  0x99   :  { %1546 = vmatpush.bf16.msra.mxu2 %v3456_v19  ;;  %v4640_v19 = vld [vmem:[#allocation5 + $0x5b4] sm:$0xf0] }
  0x9a   :  { %1520 = vmatpush.bf16.msra.mxu3 %v3200_v22  ;;  %v4510_v22 = vld [vmem:[#allocation5 + $0x1ac] sm:$0xf]  ;;  %v3760_v25 = vor.u32 %v4640_v19, %v3759_v18  ;;  %v3696_v18 = vor.u32 %v4624_v10, %v3695_v9  ;;  %v3679_v19 = vld [vmem:[#allocation5 + $0x508] sm:$0xf]  ;;  %v3489_v10 = vld [vmem:[#allocation5 + $0x398] sm:$0xf0] }
  0x9b   :  { %1535 = vmatpush.bf16.msrb.mxu0 %v3296_v50  ;;  %v3252_v29 = vor.u32 %v4510_v22, %v3249_v23  ;;  %v3217_v50 = vld [vmem:[#allocation5 + $0x178] sm:$0xf0] }
  0x9c   :  { %1509 = vmatpush.bf16.msrb.mxu1 %v3040_v44  ;;  %v3727_v44 = vld [vmem:[#allocation5 + $0x568] sm:$0xf] }
  0x9d   :  { %1547 = vmatpush.bf16.msra.mxu2 %v3440_v34  ;;  %v4600_v34 = vld [vmem:[#allocation5 + $0x474] sm:$0xf0]  ;;  %v3728_v53 = vor.u32 %v4632_v46, %v3727_v44  ;;  %v3521_v46 = vld [vmem:[#allocation5 + $0x3d8] sm:$0xf0] }
  0x9e   :  { %1521 = vmatpush.bf16.msra.mxu3 %v3184_v40  ;;  %1536 = vmatmul.bf16.vlgmr.msrb.gmra.mxu0 %v5076_v51  ;;  %v4470_v40 = vld [vmem:[#allocation5 + $0x6c] sm:$0xf]  ;;  %v3600_v42 = vor.u32 %v4600_v34, %v3599_v33  ;;  %v3393_v33 = vld [vmem:[#allocation5 + $0x2d8] sm:$0xf0] }
  0x9f   :  { %1587 = vmatpush.bf16.msra.mxu0 %v3808_v59  ;;  %1510 = vmatmul.bf16.vlgmr.msrb.gmra.mxu1 %v5078_v55  ;;  %v3092_v52 = vor.u32 %v4470_v40, %v3089_v41  ;;  %v4490_v34 = vld [vmem:[#allocation5 + $0x10c] sm:$0xf] }
  0xa0   :  { %1554 = vmatpush.bf16.msra.mxu1 %v3664_v49  ;;  %v4502_v49 = vld [vmem:[#allocation5 + $0x16c] sm:$0xf]  ;;  %v3172_v44 = vor.u32 %v4490_v34, %v3169_v36 }
  0xa1   :  { %1548 = vmatpush.bf16.msra.mxu2 %v3424_v56  ;;  %v3073_v56 = vld [vmem:[#allocation5 + $0x58] sm:$0xf0]  ;;  %v3220_v59 = vor.u32 %v4502_v49, %v3217_v50  ;;  %v4542_v50 = vld [vmem:[#allocation5 + $0x2ac] sm:$0xf] }
  0xa2   :  { %1522 = vmatpush.bf16.msra.mxu3 %v3168_v62  ;;  %v3567_v62 = vld [vmem:[#allocation5 + $0x428] sm:$0xf]  ;;  %v3076_v2 = vor.u32 %v4466_v54, %v3073_v56  ;;  %v3777_v54 = vld [vmem:[#allocation5 + $0x5d8] sm:$0xf0]  ;;  %v4562_v34 = vld [vmem:[#allocation5 + $0x34c] sm:$0xf] }
  0xa3   :  { %1606 = vmatpush.bf16.msrb.mxu0 %v3284_v4  ;;  %v4462_v4 = vld [vmem:[#allocation5 + $0x2c] sm:$0xf] }
  0xa4   :  { %1555 = vmatpush.bf16.msra.mxu1 %v3648_v3  ;;  %1549 = vmatmul.bf16.vlgmr.msra.gmra.mxu2 %v5080_v57  ;;  %v3712_v3 = vor.u32 %v4628_v61, %v3711_v60  ;;  %v3060_v15 = vor.u32 %v4462_v4, %v3057_v5  ;;  %v3505_v61 = vld [vmem:[#allocation5 + $0x3b8] sm:$0xf0] }
  0xa5   :  { %1593 = vmatpush.bf16.msrb.mxu2 %v3156_v63  ;;  %1523 = vmatmul.bf16.vlgmr.msra.gmra.mxu3 %v5084_v7  ;;  %v4592_v63 = vld [vmem:[#allocation5 + $0x434] sm:$0xf0]  ;;  %v3761_v4 = vld [vmem:[#allocation5 + $0x5b8] sm:$0xf0] }
  0xa6   :  { %1567 = vmatpush.bf16.msrb.mxu3 %v3792_v0  ;;  %v4498_v0 = vld [vmem:[#allocation5 + $0x14c] sm:$0xf]  ;;  %v3568_v6 = vor.u32 %v4592_v63, %v3567_v62  ;;  %v3633_v63 = vld [vmem:[#allocation5 + $0x4b8] sm:$0xf0] }
  0xa7   :  { %1607 = vmatpush.bf16.msrb.mxu0 %v3268_v17  ;;  %v3204_v8 = vor.u32 %v4498_v0, %v3201_v1  ;;  %v3409_v17 = vld [vmem:[#allocation5 + $0x2f8] sm:$0xf0]  ;;  %v4606_v62 = vld [vmem:[#allocation5 + $0x4ac] sm:$0xf] }
  0xa8   :  { %1556 = vmatpush.bf16.msra.mxu1 %v3632_v16  ;;  %v4550_v16 = vld [vmem:[#allocation5 + $0x2ec] sm:$0xf] }
  0xa9   :  { %1594 = vmatpush.bf16.msrb.mxu2 %v3140_v12  ;;  %v4588_v12 = vld [vmem:[#allocation5 + $0x414] sm:$0xf0]  ;;  %v3412_v27 = vor.u32 %v4550_v16, %v3409_v17  ;;  %v4538_v1 = vld [vmem:[#allocation5 + $0x28c] sm:$0xf]  ;;  %v3745_v17 = vld [vmem:[#allocation5 + $0x598] sm:$0xf0] }
  0xaa   :  { %1568 = vmatpush.bf16.msrb.mxu3 %v3776_v13  ;;  %v4494_v13 = vld [vmem:[#allocation5 + $0x12c] sm:$0xf]  ;;  %v3552_v22 = vor.u32 %v4588_v12, %v3551_v11  ;;  %v3617_v12 = vld [vmem:[#allocation5 + $0x498] sm:$0xf0] }
  0xab   :  { %1608 = vmatpush.bf16.msrb.mxu0 %v3252_v29  ;;  %v3188_v23 = vor.u32 %v4494_v13, %v3185_v14  ;;  %v3665_v29 = vld [vmem:[#allocation5 + $0x4f8] sm:$0xf0]  ;;  %v4602_v11 = vld [vmem:[#allocation5 + $0x48c] sm:$0xf] }
  0xac   :  { %1557 = vmatpush.bf16.msra.mxu1 %v3616_v28  ;;  %v4614_v28 = vld [vmem:[#allocation5 + $0x4ec] sm:$0xf] }
  0xad   :  { %1595 = vmatpush.bf16.msrb.mxu2 %v3124_v24  ;;  %v4620_v24 = vld [vmem:[#allocation5 + $0x514] sm:$0xf0]  ;;  %v3668_v41 = vor.u32 %v4614_v28, %v3665_v29  ;;  %v4534_v14 = vld [vmem:[#allocation5 + $0x26c] sm:$0xf]  ;;  %v3729_v29 = vld [vmem:[#allocation5 + $0x578] sm:$0xf0] }
  0xae   :  { %1569 = vmatpush.bf16.msrb.mxu3 %v3760_v25  ;;  %3815 = vmatmul.msk.bf16.vlgmr.msra.gmra.mxu0 %vm1316_vm0, %v5088_v45  ;;  %v4582_v25 = vld [vmem:[#allocation5 + $0x3ec] sm:$0xf]  ;;  %v3680_v37 = vor.u32 %v4620_v24, %v3679_v19  ;;  %v3620_v19 = vor.u32 %v4602_v11, %v3617_v12  ;;  %v3601_v24 = vld [vmem:[#allocation5 + $0x478] sm:$0xf0] }
  0xaf   :  { %1609 = vmatpush.bf16.msrb.mxu0 %v3236_v43  ;;  %v3540_v40 = vor.u32 %v4582_v25, %v3537_v26  ;;  %v3396_v43 = vor.u32 %v4546_v31, %v3393_v33  ;;  %v4530_v26 = vld [vmem:[#allocation5 + $0x24c] sm:$0xf]  ;;  %v3553_v11 = vld [vmem:[#allocation5 + $0x418] sm:$0xf0] }
  0xb0   :  { %1558 = vmatpush.bf16.msra.mxu1 %v3600_v42  ;;  %v4578_v42 = vld [vmem:[#allocation5 + $0x3cc] sm:$0xf] }
  0xb1   :  { %1596 = vmatpush.bf16.msrb.mxu2 %v3108_v38  ;;  %v4646_v38 = vld [vmem:[#allocation5 + $0x5ec] sm:$0xf]  ;;  %v3524_v56 = vor.u32 %v4578_v42, %v3521_v46 }
  0xb2   :  { %1570 = vmatpush.bf16.msrb.mxu3 %v3744_v39  ;;  %v3793_v39 = vld [vmem:[#allocation5 + $0x5f8] sm:$0xf0]  ;;  %v4630_v28 = vld [vmem:[#allocation5 + $0x56c] sm:$0xf] }
  0xb3   :  { %1610 = vmatpush.bf16.msrb.mxu0 %v3220_v59  ;;  %v3796_v49 = vor.u32 %v4646_v38, %v3793_v39  ;;  %v4574_v59 = vld [vmem:[#allocation5 + $0x3ac] sm:$0xf]  ;;  %v3457_v38 = vld [vmem:[#allocation5 + $0x358] sm:$0xf0] }
  0xb4   :  { %1559 = vmatpush.bf16.msra.mxu1 %v3584_v58  ;;  %v3652_v58 = vor.u32 %v4610_v47, %v3649_v48  ;;  %v3508_v5 = vor.u32 %v4574_v59, %v3505_v61  ;;  %v4594_v39 = vld [vmem:[#allocation5 + $0x44c] sm:$0xf]  ;;  %v3713_v47 = vld [vmem:[#allocation5 + $0x558] sm:$0xf0]  ;;  %v3460_v48 = vor.u32 %v4562_v34, %v3457_v38  ;;  %v3899_v38 = vld [vmem:[#allocation8 + $0xa0] sm:$0xf] }
  0xb5   :  { %1597 = vmatpush.bf16.msrb.mxu2 %v3092_v52  ;;  %v3377_v52 = vld [vmem:[#allocation5 + $0x2b8] sm:$0xf0]  ;;  %v4526_v42 = vld [vmem:[#allocation5 + $0x22c] sm:$0xf] }
  0xb6   :  { %1571 = vmatpush.bf16.msrb.mxu3 %v3728_v53  ;;  %v4642_v53 = vld [vmem:[#allocation5 + $0x5cc] sm:$0xf]  ;;  %v3380_v60 = vor.u32 %v4542_v50, %v3377_v52 }
  0xb7   :  { %1611 = vmatpush.bf16.msrb.mxu0 %v3204_v8  ;;  %v3780_v0 = vor.u32 %v4642_v53, %v3777_v54  ;;  %v4570_v8 = vld [vmem:[#allocation5 + $0x38c] sm:$0xf]  ;;  %v3441_v53 = vld [vmem:[#allocation5 + $0x338] sm:$0xf0] }
  0xb8   :  { %1560 = vmatpush.bf16.msra.mxu1 %v3568_v6  ;;  %v3636_v6 = vor.u32 %v4606_v62, %v3633_v63  ;;  %v4626_v46 = vld [vmem:[#allocation5 + $0x54c] sm:$0xf]  ;;  %v3697_v63 = vld [vmem:[#allocation5 + $0x538] sm:$0xf0] }
  0xb9   :  { %1598 = vmatpush.bf16.msrb.mxu2 %v3076_v2  ;;  %v3361_v2 = vld [vmem:[#allocation5 + $0x298] sm:$0xf0]  ;;  %v4558_v50 = vld [vmem:[#allocation5 + $0x32c] sm:$0xf] }
  0xba   :  { %1572 = vmatpush.bf16.msrb.mxu3 %v3712_v3  ;;  %v4638_v3 = vld [vmem:[#allocation5 + $0x5ac] sm:$0xf]  ;;  %v3364_v9 = vor.u32 %v4538_v1, %v3361_v2  ;;  %v3809_v1 = vld [vmem:[#allocation5 + $0x618] sm:$0xf0]  ;;  %v5124_v2 = vld [vmem:[#allocation7] sm:$0xf] }
  0xbb   :  { %1612 = vmatpush.bf16.msrb.mxu0 %v3188_v23  ;;  %v3764_v13 = vor.u32 %v4638_v3, %v3761_v4  ;;  %v5116_v16 = vpop.f32.mrf.mxu0  ;;  %v4598_v23 = vld [vmem:[#allocation5 + $0x46c] sm:$0xf]  ;;  %v3444_v4 = vor.u32 %v4558_v50, %v3441_v53 }
  0xbc   :  { %1561 = vmatpush.bf16.msra.mxu1 %v3552_v22  ;;  %v3473_v22 = vld [vmem:[#allocation5 + $0x378] sm:$0xf0]  ;;  %v3604_v33 = vor.u32 %v4598_v23, %v3601_v24  ;;  %v4590_v54 = vld [vmem:[#allocation5 + $0x42c] sm:$0xf] }
  0xbd   :  { %1599 = vmatpush.bf16.msrb.mxu2 %v3060_v15  ;;  %v3345_v15 = vld [vmem:[#allocation5 + $0x278] sm:$0xf0]  ;;  %v4522_v59 = vld [vmem:[#allocation5 + $0x20c] sm:$0xf] }
  0xbe   :  { %1573 = vmatpush.bf16.msrb.mxu3 %v3696_v18  ;;  %v3492_v18 = vor.u32 %v4570_v8, %v3489_v10  ;;  %v3348_v21 = vor.u32 %v4534_v14, %v3345_v15  ;;  %v4622_v61 = vld [vmem:[#allocation5 + $0x52c] sm:$0xf]  ;;  %v3931_v14 = vld [vmem:[#allocation8 + $0xe0] sm:$0xf]  ;;  %v4683_v15 = vld [vmem:[#allocation8 + $0xec] sm:$0xf0] }
  0xbf   :  { %1562 = vmatmul.bf16.vlgmr.msra.gmra.mxu1 %v5092_v30  ;;  %1613 = vmatpush.bf16.msrb.mxu0 %v3172_v44  ;;  %v4586_v10 = vld [vmem:[#allocation5 + $0x40c] sm:$0xf]  ;;  %v3932_v24 = vor.u32 %v4683_v15, %v3931_v14  ;;  %v3819_v14 = vld [vmem:[#allocation8] sm:$0xf]  ;;  %v4655_v15 = vld [vmem:[#allocation8 + $0xc] sm:$0xf0] }
  0xc0   :  { %1619 = vmatpush.bf16.msrb.mxu1 %v3412_v27  ;;  %v3329_v27 = vld [vmem:[#allocation5 + $0x258] sm:$0xf0]  ;;  %v3556_v23 = vor.u32 %v4586_v10, %v3553_v11  ;;  %v3963_v11 = vld [vmem:[#allocation8 + $0x120] sm:$0xf] }
  0xc1   :  { %1600 = vmatpush.bf16.msrb.mxu2 %v3044_v32  ;;  %v3476_v32 = vor.u32 %v4566_v20, %v3473_v22  ;;  %v3332_v36 = vor.u32 %v4530_v26, %v3329_v27  ;;  %v4715_v20 = vld [vmem:[#allocation8 + $0x1ec] sm:$0xf0]  ;;  %v3915_v26 = vld [vmem:[#allocation8 + $0xc0] sm:$0xf] }
  0xc2   :  { %1574 = vmatpush.bf16.msrb.mxu3 %v3680_v37  ;;  %1614 = vmatmul.bf16.vlgmr.msrb.gmra.mxu0 %v5084_v7  ;;  %v5118_v25 = vpop.f32.mrf.mxu1  ;;  %v4679_v27 = vld [vmem:[#allocation8 + $0xcc] sm:$0xf0] }
  0xc3   :  { %1658 = vmatpush.bf16.msra.mxu0 %v3796_v49  ;;  %v5120_v31 = vpop.f32.mrf.mxu2  ;;  %v1331_v44 = vpop.f32.mrf.mxu0 }
  0xc4   :  { %1620 = vmatpush.bf16.msrb.mxu1 %v3396_v43  ;;  %1601 = vmatmul.bf16.vlgmr.msrb.gmra.mxu2 %v5078_v55  ;;  %v4634_v55 = vld [vmem:[#allocation5 + $0x58c] sm:$0xf]  ;;  %v3313_v43 = vld [vmem:[#allocation5 + $0x238] sm:$0xf0]  ;;  %v4671_v44 = vld [vmem:[#allocation8 + $0x8c] sm:$0xf0] }
  0xc5   :  { %1645 = vmatpush.bf16.msra.mxu2 %v3668_v41  ;;  %1575 = vmatmul.bf16.vlgmr.msrb.gmra.mxu3 %v5094_v35  ;;  %v3748_v7 = vor.u32 %v4634_v55, %v3745_v17  ;;  %v3732_v41 = vor.u32 %v4630_v28, %v3729_v29  ;;  %v3316_v52 = vor.u32 %v4526_v42, %v3313_v43  ;;  %v4618_v55 = vld [vmem:[#allocation5 + $0x50c] sm:$0xf]  ;;  %v4043_v29 = vld [vmem:[#allocation8 + $0x1c0] sm:$0xf]  ;;  %v4707_v42 = vld [vmem:[#allocation8 + $0x1ac] sm:$0xf0] }
  0xc6   :  { %1632 = vmatpush.bf16.msra.mxu3 %v3540_v40  ;;  %v5122_v37 = vpop.f32.mrf.mxu3  ;;  %v3585_v40 = vld [vmem:[#allocation5 + $0x458] sm:$0xf0] }
  0xc7   :  { %1659 = vmatpush.bf16.msra.mxu0 %v3780_v0  ;;  %v3588_v49 = vor.u32 %v4594_v39, %v3585_v40  ;;  %v4650_v0 = vld [vmem:[#allocation5 + $0x60c] sm:$0xf]  ;;  %v4675_v39 = vld [vmem:[#allocation8 + $0xac] sm:$0xf0] }
  0xc8   :  { %1621 = vmatpush.bf16.msrb.mxu1 %v3380_v60  ;;  %v3297_v60 = vld [vmem:[#allocation5 + $0x218] sm:$0xf0]  ;;  %v3812_v17 = vor.u32 %v4650_v0, %v3809_v1  ;;  %v3979_v0 = vld [vmem:[#allocation8 + $0x140] sm:$0xf]  ;;  %v4695_v1 = vld [vmem:[#allocation8 + $0x14c] sm:$0xf0] }
  0xc9   :  { %1646 = vmatpush.bf16.msra.mxu2 %v3652_v58  ;;  %v3716_v58 = vor.u32 %v4626_v46, %v3713_v47  ;;  %v3300_v8 = vor.u32 %v4522_v59, %v3297_v60  ;;  %v3980_v10 = vor.u32 %v4695_v1, %v3979_v0  ;;  %v4731_v0 = vld [vmem:[#allocation8 + $0x26c] sm:$0xf0]  ;;  %v329_v1 = vperm.slane %v5124_v2, 1 }
  0xca   :  { %1633 = vmatpush.bf16.msra.mxu3 %v3524_v56  ;;  %v3569_v56 = vld [vmem:[#allocation5 + $0x438] sm:$0xf0]  ;;  %v1344_v62 = vpop.f32.mrf.mxu1 }
  0xcb   :  { %1660 = vmatpush.bf16.msra.mxu0 %v3764_v13  ;;  %v1357_v3 = vpop.f32.mrf.mxu2  ;;  %v3700_v13 = vor.u32 %v4622_v61, %v3697_v63  ;;  %v3851_v61 = vld [vmem:[#allocation8 + $0x40] sm:$0xf]  ;;  %v4663_v62 = vld [vmem:[#allocation8 + $0x4c] sm:$0xf0] }
  0xcc   :  { %1622 = vmatpush.bf16.msrb.mxu1 %v3364_v9  ;;  %v3425_v9 = vld [vmem:[#allocation5 + $0x318] sm:$0xf0] }
  0xcd   :  { %1647 = vmatpush.bf16.msra.mxu2 %v3636_v6  ;;  %v4554_v6 = vld [vmem:[#allocation5 + $0x30c] sm:$0xf] }
  0xce   :  { %1634 = vmatpush.bf16.msra.mxu3 %v3508_v5  ;;  %v3572_v5 = vor.u32 %v4590_v54, %v3569_v56  ;;  %v1370_v12 = vpop.f32.mrf.mxu3  ;;  %v3428_v22 = vor.u32 %v4554_v6, %v3425_v9  ;;  %v4667_v54 = vld [vmem:[#allocation8 + $0x6c] sm:$0xf0]  ;;  %v3995_v56 = vld [vmem:[#allocation8 + $0x160] sm:$0xf] }
  0xcf   :  { %1661 = vmatpush.bf16.msra.mxu0 %v3748_v7  ;;  %v4659_v9 = vld [vmem:[#allocation8 + $0x2c] sm:$0xf0] }
  0xd0   :  { %1623 = vmatpush.bf16.msrb.mxu1 %v3348_v21  ;;  %v328_v21 = vperm.slane %v5124_v2, 0  ;;  %v4691_v12 = vld [vmem:[#allocation8 + $0x12c] sm:$0xf0] }
  0xd1   :  { %1648 = vmatpush.bf16.msra.mxu2 %v3620_v19  ;;  %v4059_v19 = vld [vmem:[#allocation8 + $0x1e0] sm:$0xf] }
  0xd2   :  { %1635 = vmatpush.bf16.msra.mxu3 %v3492_v18  ;;  %v3681_v18 = vld [vmem:[#allocation5 + $0x518] sm:$0xf0]  ;;  %v4060_v28 = vor.u32 %v4715_v20, %v4059_v19  ;;  %v4747_v19 = vld [vmem:[#allocation8 + $0x2ec] sm:$0xf0] }
  0xd3   :  { %1662 = vmatpush.bf16.msra.mxu0 %v3732_v41  ;;  %v3684_v7 = vor.u32 %v4618_v55, %v3681_v18  ;;  %v5129_v34 = vpop.f32.mrf.mxu2  ;;  %v4027_v41 = vld [vmem:[#allocation8 + $0x1a0] sm:$0xf] }
  0xd4   :  { %1624 = vmatpush.bf16.msrb.mxu1 %v3332_v36  ;;  %v3916_v36 = vor.u32 %v4679_v27, %v3915_v26  ;;  %v4028_v46 = vor.u32 %v4707_v42, %v4027_v41  ;;  %v4187_v18 = vld [vmem:[#allocation8 + $0x2e0] sm:$0xf]  ;;  %v4061_v26 = vld [vmem:[#allocation8 + $0x1f0] sm:$0xf0]  ;;  %v3820_v27 = vor.u32 %v4655_v15, %v3819_v14  ;;  %v4709_v42 = vld [vmem:[#allocation8 + $0x1c4] sm:$0xf] }
  0xd5   :  { %1649 = vmatpush.bf16.msra.mxu2 %v3604_v33  ;;  %v1330_v33 = vadd.f32 %v5116_v16, %v328_v21  ;;  %v3883_v16 = vld [vmem:[#allocation8 + $0x80] sm:$0xf]  ;;  %v3933_v21 = vld [vmem:[#allocation8 + $0xf0] sm:$0xf0]  ;;  %v4661_v15 = vld [vmem:[#allocation8 + $0x44] sm:$0xf] }
  0xd6   :  { %1636 = vmatpush.bf16.msra.mxu3 %v3476_v32  ;;  %v4711_v32 = vld [vmem:[#allocation8 + $0x1cc] sm:$0xf0]  ;;  %v3884_v53 = vor.u32 %v4671_v44, %v3883_v16  ;;  %v4155_v44 = vld [vmem:[#allocation8 + $0x2a0] sm:$0xf] }
  0xd7   :  { %1663 = vmatpush.bf16.msra.mxu0 %v3716_v58  ;;  %v4044_v40 = vor.u32 %v4711_v32, %v4043_v29  ;;  %v1343_v43 = vadd.f32 %v5118_v25, %v1330_v33  ;;  %v3867_v25 = vld [vmem:[#allocation8 + $0x60] sm:$0xf] }
  0xd8   :  { %1625 = vmatpush.bf16.msrb.mxu1 %v3316_v52  ;;  %v3868_v59 = vor.u32 %v4667_v54, %v3867_v25  ;;  %v4139_v25 = vld [vmem:[#allocation8 + $0x280] sm:$0xf]  ;;  %v4735_v54 = vld [vmem:[#allocation8 + $0x28c] sm:$0xf0] }
  0xd9   :  { %1650 = vmatpush.bf16.msra.mxu2 %v3588_v49  ;;  %v4703_v49 = vld [vmem:[#allocation8 + $0x18c] sm:$0xf0]  ;;  %v1356_v50 = vadd.f32 %v5120_v31, %v1343_v43  ;;  %v4045_v43 = vld [vmem:[#allocation8 + $0x1d0] sm:$0xf0] }
  0xda   :  { %1637 = vmatpush.bf16.msra.mxu3 %v3460_v48  ;;  %v4011_v48 = vld [vmem:[#allocation8 + $0x180] sm:$0xf] }
  0xdb   :  { %1664 = vmatpush.bf16.msra.mxu0 %v3700_v13  ;;  %v1381_v47 = vpop.f32.mrf.mxu0  ;;  %v1409_v52 = vpop.f32.mrf.mxu2  ;;  %v1369_v58 = vadd.f32 %v5122_v37, %v1356_v50 }
  0xdc   :  { %1626 = vmatpush.bf16.msrb.mxu1 %v3300_v8  ;;  %v3835_v8 = vld [vmem:[#allocation8 + $0x20] sm:$0xf]  ;;  %v4029_v52 = vld [vmem:[#allocation8 + $0x1b0] sm:$0xf0] }
  0xdd   :  { %1651 = vmatpush.bf16.msra.mxu2 %v3572_v5  ;;  %v1382_v60 = vadd.f32 %v1381_v47, %v1369_v58  ;;  %v3852_v5 = vor.u32 %v4663_v62, %v3851_v61  ;;  %v3836_v13 = vor.u32 %v4659_v9, %v3835_v8  ;;  %v4673_v47 = vld [vmem:[#allocation8 + $0xa4] sm:$0xf]  ;;  %v4140_v58 = vor.u32 %v4735_v54, %v4139_v25 }
  0xde   :  { %1638 = vmatpush.bf16.msra.mxu3 %v3444_v4  ;;  %v4697_v9 = vld [vmem:[#allocation8 + $0x164] sm:$0xf] }
  0xdf   :  { %1627 = vmatmul.bf16.vlgmr.msrb.gmra.mxu1 %v5076_v51  ;;  %1665 = vmatpush.bf16.msra.mxu0 %v3684_v7  ;;  %v3900_v51 = vor.u32 %v4675_v39, %v3899_v38  ;;  %v4713_v7 = vld [vmem:[#allocation8 + $0x1e4] sm:$0xf]  ;;  %v3917_v39 = vld [vmem:[#allocation8 + $0xd0] sm:$0xf0] }
  0xe0   :  { %1678 = vmatpush.bf16.msra.mxu1 %v3812_v17  ;;  %v3964_v17 = vor.u32 %v4691_v12, %v3963_v11  ;;  %v4677_v38 = vld [vmem:[#allocation8 + $0xc4] sm:$0xf]  ;;  %v4107_v12 = vld [vmem:[#allocation8 + $0x240] sm:$0xf] }
  0xe1   :  { %1652 = vmatpush.bf16.msra.mxu2 %v3556_v23  ;;  %v4687_v23 = vld [vmem:[#allocation8 + $0x10c] sm:$0xf0]  ;;  %v3920_v16 = vor.u32 %v4677_v38, %v3917_v39  ;;  %v4653_v38 = vld [vmem:[#allocation8 + $0x4] sm:$0xf] }
  0xe2   :  { %1639 = vmatpush.bf16.msra.mxu3 %v3428_v22  ;;  %1666 = vmatmul.bf16.vlgmr.msra.gmra.mxu0 %v5094_v35  ;;  %v4699_v35 = vld [vmem:[#allocation8 + $0x16c] sm:$0xf0]  ;;  %v3947_v22 = vld [vmem:[#allocation8 + $0x100] sm:$0xf] }
  0xe3   :  { %v3996_v63 = vor.u32 %v4699_v35, %v3995_v56  ;;  %v1383_v3 = vpop.f32.mrf.mxu0  ;;  %v3948_v33 = vor.u32 %v4687_v23, %v3947_v22  ;;  %v3885_v56 = vld [vmem:[#allocation8 + $0x90] sm:$0xf0] }
  0xe4   :  { %2483 = vmatpush.bf16.msrb.mxu1 %v4060_v28  ;;  %1653 = vmatmul.bf16.vlgmr.msra.gmra.mxu2 %v5092_v30  ;;  %v4012_v30 = vor.u32 %v4703_v49, %v4011_v48  ;;  %v5137_v31 = vpop.f32.mrf.mxu3  ;;  %v3901_v48 = vld [vmem:[#allocation8 + $0xb0] sm:$0xf0]  ;;  %v4048_v49 = vor.u32 %v4709_v42, %v4045_v43  ;;  %v4719_v42 = vld [vmem:[#allocation8 + $0x20c] sm:$0xf0]  ;;  %v3939_v43 = vld [vmem:[#allocation8 + $0xe8] sm:$0xf] }
  0xe5   :  { %1640 = vmatmul.bf16.vlgmr.msra.gmra.mxu3 %v5080_v57  ;;  %v1394_v57 = vpop.f32.mrf.mxu1  ;;  %v1421_v14 = vadd.f32 %v5137_v31, %v329_v1 }
  0xe6   :  { %2470 = vmatpush.bf16.msrb.mxu3 %v3932_v24  ;;  %v1395_v37 = vadd.f32 %v1394_v57, %v1382_v60  ;;  %v4188_v24 = vor.u32 %v4747_v19, %v4187_v18  ;;  %v4705_v57 = vld [vmem:[#allocation8 + $0x1a4] sm:$0xf]  ;;  %v4013_v60 = vld [vmem:[#allocation8 + $0x190] sm:$0xf0] }
  0xe7   :  { %v5141_v6 = vpop.f32.mrf.mxu2  ;;  %v4032_v35 = vor.u32 %v4705_v57, %v4029_v52  ;;  %v4693_v19 = vld [vmem:[#allocation8 + $0x144] sm:$0xf] }
  0xe8   :  { %2484 = vmatpush.bf16.msrb.mxu1 %v4044_v40  ;;  %v1408_v55 = vadd.f32 %v5129_v34, %v1395_v37  ;;  %2496 = vmatpush.bf16.msrb.mxu2 %v4188_v24  ;;  %v4171_v34 = vld [vmem:[#allocation8 + $0x2c0] sm:$0xf]  ;;  %v4064_v40 = vor.u32 %v4713_v7, %v4061_v26  ;;  %v4723_v7 = vld [vmem:[#allocation8 + $0x22c] sm:$0xf0]  ;;  %v1434_v26 = vadd.f32 %v5141_v6, %v1421_v14  ;;  %v4067_v14 = vld [vmem:[#allocation8 + $0x1e8] sm:$0xf] }
  0xe9   :  { %v4091_v24 = vld [vmem:[#allocation8 + $0x220] sm:$0xf] }
  0xea   :  { %2471 = vmatpush.bf16.msrb.mxu3 %v3916_v36  ;;  %v1684_v29 = vmax.f32 %v1408_v55, 0.0  ;;  %v4743_v36 = vld [vmem:[#allocation8 + $0x2cc] sm:$0xf0]  ;;  %v3853_v55 = vld [vmem:[#allocation8 + $0x50] sm:$0xf0] }
  0xeb   :  { %v4172_v41 = vor.u32 %v4743_v36, %v4171_v34  ;;  %v3856_v23 = vor.u32 %v4661_v15, %v3853_v55  ;;  %v3965_v34 = vld [vmem:[#allocation8 + $0x130] sm:$0xf0]  ;;  %v4716_v15 = vld [vmem:[#allocation8 + $0x1f4] sm:$0xf0] }
  0xec   :  { %2485 = vmatpush.bf16.msrb.mxu1 %v4028_v46  ;;  %v1422_v20 = vpop.f32.mrf.mxu3  ;;  %v4739_v46 = vld [vmem:[#allocation8 + $0x2ac] sm:$0xf0] }
  0xed   :  { %v1396_v4 = vpop.f32.mrf.mxu1  ;;  %2497 = vmatpush.bf16.msrb.mxu2 %v4172_v41  ;;  %v4156_v50 = vor.u32 %v4739_v46, %v4155_v44  ;;  %v3981_v20 = vld [vmem:[#allocation8 + $0x150] sm:$0xf0]  ;;  %v4075_v41 = vld [vmem:[#allocation8 + $0x200] sm:$0xf]  ;;  %v4745_v44 = vld [vmem:[#allocation8 + $0x2e4] sm:$0xf] }
  0xee   :  { %2472 = vmatpush.bf16.msrb.mxu3 %v3900_v51  ;;  %v5144_v51 = vpack.c.bf16 %v1684_v29, %v1684_v29  ;;  %v4665_v4 = vld [vmem:[#allocation8 + $0x64] sm:$0xf]  ;;  %v3984_v31 = vor.u32 %v4693_v19, %v3981_v20  ;;  %v4076_v6 = vor.u32 %v4719_v42, %v4075_v41  ;;  %v4189_v46 = vld [vmem:[#allocation8 + $0x2f0] sm:$0xf0]  ;;  %v4672_v19 = vld [vmem:[#allocation8 + $0x94] sm:$0xf0] }
  0xef   :  { %3816 = vmatmul.msk.bf16.vlgmr.msra.gmra.mxu1 %vm1316_vm0, %v5088_v45  ;;  %v4681_v45 = vld [vmem:[#allocation8 + $0xe4] sm:$0xf]  ;;  %v1435_v28 = vpop.f32.mrf.mxu2  ;;  %v4192_v57 = vor.u32 %v4745_v44, %v4189_v46  ;;  %v4267_v42 = vld [vmem:[#allocation8 + $0x380] sm:$0xf] }
  0xf0   :  { %2486 = vmatpush.bf16.msrb.mxu1 %v4012_v30  ;;  %v3936_v32 = vor.u32 %v4681_v45, %v3933_v21  ;;  %v4669_v30 = vld [vmem:[#allocation8 + $0x84] sm:$0xf]  ;;  %v3837_v28 = vld [vmem:[#allocation8 + $0x30] sm:$0xf0] }
  0xf1   :  { %2498 = vmatpush.bf16.msrb.mxu2 %v4156_v50  ;;  %v3888_v62 = vor.u32 %v4669_v30, %v3885_v56  ;;  %v3949_v50 = vld [vmem:[#allocation8 + $0x110] sm:$0xf0]  ;;  %v3923_v56 = vld [vmem:[#allocation8 + $0xc8] sm:$0xf]  ;;  %v4733_v20 = vld [vmem:[#allocation8 + $0x284] sm:$0xf] }
  0xf2   :  { %2473 = vmatpush.bf16.msrb.mxu3 %v3884_v53  ;;  %v3904_v53 = vor.u32 %v4673_v47, %v3901_v48  ;;  %v4684_v48 = vld [vmem:[#allocation8 + $0xf4] sm:$0xf0] }
  0xf3   :  { %v3940_v30 = vor.u32 %v4684_v48, %v3939_v43  ;;  %v4767_v43 = vld [vmem:[#allocation8 + $0x38c] sm:$0xf0]  ;;  %v3859_v48 = vld [vmem:[#allocation8 + $0x48] sm:$0xf] }
  0xf4   :  { %2487 = vmatpush.bf16.msrb.mxu1 %v3996_v63  ;;  %v4123_v63 = vld [vmem:[#allocation8 + $0x260] sm:$0xf]  ;;  %v4268_v44 = vor.u32 %v4767_v43, %v4267_v42  ;;  %v4777_v42 = vld [vmem:[#allocation8 + $0x3e4] sm:$0xf]  ;;  %v4317_v43 = vld [vmem:[#allocation8 + $0x3f0] sm:$0xf0] }
  0xf5   :  { %2499 = vmatpush.bf16.msrb.mxu2 %v4140_v58  ;;  %v4124_v8 = vor.u32 %v4731_v0, %v4123_v63  ;;  %v4741_v58 = vld [vmem:[#allocation8 + $0x2c4] sm:$0xf]  ;;  %v4779_v63 = vld [vmem:[#allocation8 + $0x3ec] sm:$0xf0] }
  0xf6   :  { %2474 = vmatpush.bf16.msrb.mxu3 %v3868_v59  ;;  %v4701_v59 = vld [vmem:[#allocation8 + $0x184] sm:$0xf] }
  0xf7   :  { %v4016_v37 = vor.u32 %v4701_v59, %v4013_v60  ;;  %v4173_v59 = vld [vmem:[#allocation8 + $0x2d0] sm:$0xf0]  ;;  %v4680_v60 = vld [vmem:[#allocation8 + $0xd4] sm:$0xf0] }
  0xf8   :  { %2488 = vmatpush.bf16.msrb.mxu1 %v3980_v10  ;;  %v3997_v10 = vld [vmem:[#allocation8 + $0x170] sm:$0xf0] }
  0xf9   :  { %2500 = vmatpush.bf16.msrb.mxu2 %v4124_v8  ;;  %v4000_v45 = vor.u32 %v4697_v9, %v3997_v10  ;;  %v4676_v9 = vld [vmem:[#allocation8 + $0xb4] sm:$0xf0] }
  0xfa   :  { %2475 = vmatpush.bf16.msrb.mxu3 %v3852_v5  ;;  %v3869_v5 = vld [vmem:[#allocation8 + $0x70] sm:$0xf0] }
  0xfb   :  { %v1446_v61 = vpop.f32.mrf.mxu0  ;;  %v3872_v11 = vor.u32 %v4665_v4, %v3869_v5  ;;  %v3907_v4 = vld [vmem:[#allocation8 + $0xa8] sm:$0xf]  ;;  %v4737_v5 = vld [vmem:[#allocation8 + $0x2a4] sm:$0xf] }
  0xfc   :  { %2489 = vmatpush.bf16.msrb.mxu1 %v3964_v17  ;;  %v1459_v3 = vpop.f32.mrf.mxu1  ;;  %v1447_v36 = vadd.f32 %v1446_v61, %v1434_v26  ;;  %v4176_v61 = vor.u32 %v4741_v58, %v4173_v59  ;;  %v4051_v26 = vld [vmem:[#allocation8 + $0x1c8] sm:$0xf] }
  0xfd   :  { %v3843_v59 = vld [vmem:[#allocation8 + $0x28] sm:$0xf] }
  0xfe   :  { %2476 = vmatpush.bf16.msrb.mxu3 %v3836_v13  ;;  %v4727_v13 = vld [vmem:[#allocation8 + $0x24c] sm:$0xf0]  ;;  %v1460_v52 = vadd.f32 %v1459_v3, %v1447_v36  ;;  %v3924_v3 = vor.u32 %v4680_v60, %v3923_v56  ;;  %v4704_v56 = vld [vmem:[#allocation8 + $0x194] sm:$0xf0]  ;;  %v4721_v60 = vld [vmem:[#allocation8 + $0x224] sm:$0xf] }
  0xff   :  { %v4108_v17 = vor.u32 %v4727_v13, %v4107_v12  ;;  %v4775_v12 = vld [vmem:[#allocation8 + $0x3cc] sm:$0xf0] }
 0x100   :  { %2490 = vmatpush.bf16.msrb.mxu1 %v3948_v33  ;;  %v4689_v33 = vld [vmem:[#allocation8 + $0x124] sm:$0xf] }
 0x101   :  { %2501 = vmatpush.bf16.msrb.mxu2 %v4108_v17 }
 0x102   :  { %2477 = vmatpush.bf16.msrb.mxu3 %v3820_v27  ;;  %v4657_v27 = vld [vmem:[#allocation8 + $0x24] sm:$0xf] }
 0x103   :  { %v1448_v21 = vpop.f32.mrf.mxu0  ;;  %v3840_v39 = vor.u32 %v4657_v27, %v3837_v28  ;;  %v4712_v27 = vld [vmem:[#allocation8 + $0x1d4] sm:$0xf0] }
 0x104   :  { %2535 = vmatpush.bf16.msra.mxu1 %v4064_v40  ;;  %v1472_v18 = vpop.f32.mrf.mxu3  ;;  %v1461_v29 = vpop.f32.mrf.mxu1  ;;  %v3821_v40 = vld [vmem:[#allocation8 + $0x10] sm:$0xf0]  ;;  %v4068_v21 = vor.u32 %v4716_v15, %v4067_v14  ;;  %v4656_v14 = vld [vmem:[#allocation8 + $0x14] sm:$0xf0]  ;;  %v4717_v15 = vld [vmem:[#allocation8 + $0x204] sm:$0xf] }
 0x105   :  { %2478 = vmatmul.bf16.vlgmr.msrb.gmra.mxu3 %v5144_v51  ;;  %v1473_v54 = vadd.f32 %v1472_v18, %v1460_v52  ;;  %v3908_v18 = vor.u32 %v4676_v9, %v3907_v4  ;;  %v4664_v52 = vld [vmem:[#allocation8 + $0x54] sm:$0xf0]  ;;  %v4235_v4 = vld [vmem:[#allocation8 + $0x340] sm:$0xf] }
 0x106   :  { %2522 = vmatpush.bf16.msra.mxu3 %v3936_v32  ;;  %v4092_v32 = vor.u32 %v4723_v7, %v4091_v24  ;;  %v4771_v24 = vld [vmem:[#allocation8 + $0x3ac] sm:$0xf0]  ;;  %v3860_v58 = vor.u32 %v4664_v52, %v3859_v48  ;;  %v3909_v52 = vld [vmem:[#allocation8 + $0xb8] sm:$0xf0] }
 0x107   :  { %v1485_v22 = vpop.f32.mrf.mxu2 }
 0x108   :  { %2536 = vmatpush.bf16.msra.mxu1 %v4048_v49  ;;  %2502 = vmatpush.bf16.msrb.mxu2 %v4092_v32  ;;  %v4685_v49 = vld [vmem:[#allocation8 + $0x104] sm:$0xf]  ;;  %v1486_v1 = vadd.f32 %v1485_v22, %v1473_v54  ;;  %v4141_v22 = vld [vmem:[#allocation8 + $0x290] sm:$0xf0]  ;;  %v3875_v32 = vld [vmem:[#allocation8 + $0x68] sm:$0xf] }
 0x109   :  { %v4144_v28 = vor.u32 %v4733_v20, %v4141_v22  ;;  %v4763_v54 = vld [vmem:[#allocation8 + $0x36c] sm:$0xf0]  ;;  %v4682_v22 = vld [vmem:[#allocation8 + $0xec] sm:$0xf] }
 0x10a   :  { %2523 = vmatpush.bf16.msra.mxu3 %v3920_v16  ;;  %v3968_v16 = vor.u32 %v4689_v33, %v3965_v34  ;;  %v4729_v33 = vld [vmem:[#allocation8 + $0x264] sm:$0xf]  ;;  %v4125_v34 = vld [vmem:[#allocation8 + $0x270] sm:$0xf0]  ;;  %v4755_v20 = vld [vmem:[#allocation8 + $0x32c] sm:$0xf0] }
 0x10b   :  { %v4128_v41 = vor.u32 %v4729_v33, %v4125_v34 }
 0x10c   :  { %2537 = vmatpush.bf16.msra.mxu1 %v4032_v35  ;;  %v1474_v47 = vpop.f32.mrf.mxu3  ;;  %2503 = vmatpush.bf16.msrb.mxu2 %v4076_v6  ;;  %v3952_v35 = vor.u32 %v4685_v49, %v3949_v50  ;;  %v4708_v6 = vld [vmem:[#allocation8 + $0x1b4] sm:$0xf0]  ;;  %v4725_v49 = vld [vmem:[#allocation8 + $0x244] sm:$0xf]  ;;  %v4109_v50 = vld [vmem:[#allocation8 + $0x250] sm:$0xf0] }
 0x10e   :  { %2524 = vmatpush.bf16.msra.mxu3 %v3904_v53  ;;  %v3824_v53 = vor.u32 %v4653_v38, %v3821_v40  ;;  %v4668_v40 = vld [vmem:[#allocation8 + $0x74] sm:$0xf0] }
 0x10f   :  { %v1487_v25 = vpop.f32.mrf.mxu2  ;;  %v3876_v47 = vor.u32 %v4668_v40, %v3875_v32  ;;  %v4678_v32 = vld [vmem:[#allocation8 + $0xcc] sm:$0xf]  ;;  %v3925_v40 = vld [vmem:[#allocation8 + $0xd8] sm:$0xf0] }
 0x110   :  { %2538 = vmatpush.bf16.msra.mxu1 %v4016_v37  ;;  %2548 = vmatpush.bf16.msra.mxu2 %v4192_v57  ;;  %v4157_v37 = vld [vmem:[#allocation8 + $0x2b0] sm:$0xf0]  ;;  %v4251_v25 = vld [vmem:[#allocation8 + $0x360] sm:$0xf]  ;;  %v3928_v48 = vor.u32 %v4678_v32, %v3925_v40  ;;  %v3845_v40 = vld [vmem:[#allocation8 + $0x38] sm:$0xf0] }
 0x111   :  { %v4160_v10 = vor.u32 %v4737_v5, %v4157_v37  ;;  %v4759_v5 = vld [vmem:[#allocation8 + $0x34c] sm:$0xf0]  ;;  %v4003_v37 = vld [vmem:[#allocation8 + $0x168] sm:$0xf] }
 0x112   :  { %2525 = vmatpush.bf16.msra.mxu3 %v3888_v62  ;;  %v4315_v62 = vld [vmem:[#allocation8 + $0x3e0] sm:$0xf]  ;;  %v4236_v9 = vor.u32 %v4759_v5, %v4235_v4  ;;  %v4710_v5 = vld [vmem:[#allocation8 + $0x1cc] sm:$0xf] }
 0x113   :  { %v4316_v0 = vor.u32 %v4779_v63, %v4315_v62 }
 0x114   :  { %2539 = vmatpush.bf16.msra.mxu1 %v4000_v45  ;;  %2549 = vmatpush.bf16.msra.mxu2 %v4176_v61  ;;  %v1498_v8 = vpop.f32.mrf.mxu3  ;;  %v3891_v45 = vld [vmem:[#allocation8 + $0x88] sm:$0xf]  ;;  %v4093_v61 = vld [vmem:[#allocation8 + $0x230] sm:$0xf0] }
 0x115   :  { %2509 = vmatpush.bf16.msrb.mxu0 %v4316_v0  ;;  %v1499_v13 = vadd.f32 %v1498_v8, %v1486_v1  ;;  %v3892_v29 = vor.u32 %v4672_v19, %v3891_v45  ;;  %v4660_v1 = vld [vmem:[#allocation8 + $0x34] sm:$0xf0]  ;;  %v4219_v19 = vld [vmem:[#allocation8 + $0x320] sm:$0xf] }
 0x116   :  { %2526 = vmatpush.bf16.msra.mxu3 %v3872_v11  ;;  %v4299_v11 = vld [vmem:[#allocation8 + $0x3c0] sm:$0xf]  ;;  %v4700_v8 = vld [vmem:[#allocation8 + $0x174] sm:$0xf0] }
 0x117   :  { %v4300_v55 = vor.u32 %v4775_v12, %v4299_v11  ;;  %v1685_v17 = vmax.f32 %v1499_v13, 0.0  ;;  %v3827_v11 = vld [vmem:[#allocation8 + $0x8] sm:$0xf]  ;;  %v3844_v13 = vor.u32 %v4660_v1, %v3843_v59  ;;  %v4004_v45 = vor.u32 %v4700_v8, %v4003_v37  ;;  %v4769_v1 = vld [vmem:[#allocation8 + $0x3a4] sm:$0xf] }
 0x118   :  { %2540 = vmatpush.bf16.msra.mxu1 %v3984_v31  ;;  %2550 = vmatpush.bf16.msra.mxu2 %v4160_v10 }
 0x119   :  { %2510 = vmatpush.bf16.msrb.mxu0 %v4300_v55  ;;  %v5151_v7 = vpack.c.bf16 %v1685_v17, %v1685_v17  ;;  %v4077_v55 = vld [vmem:[#allocation8 + $0x210] sm:$0xf0]  ;;  %v3987_v17 = vld [vmem:[#allocation8 + $0x148] sm:$0xf] }
 0x11a   :  { %2527 = vmatpush.bf16.msra.mxu3 %v3856_v23  ;;  %v4283_v23 = vld [vmem:[#allocation8 + $0x3a0] sm:$0xf] }
 0x11b   :  { %v4284_v31 = vor.u32 %v4771_v24, %v4283_v23  ;;  %2491 = vmatmul.bf16.vlgmr.msrb.gmra.mxu1 %v5151_v7  ;;  %v5154_v38 = vpop.f32.mrf.mxu0  ;;  %v3941_v23 = vld [vmem:[#allocation8 + $0xf8] sm:$0xf0]  ;;  %v4220_v24 = vor.u32 %v4755_v20, %v4219_v19  ;;  %v4662_v19 = vld [vmem:[#allocation8 + $0x4c] sm:$0xf] }
 0x11c   :  { %2541 = vmatpush.bf16.msra.mxu1 %v3968_v16  ;;  %v1500_v36 = vpop.f32.mrf.mxu3  ;;  %2551 = vmatpush.bf16.msra.mxu2 %v4144_v28  ;;  %v4035_v16 = vld [vmem:[#allocation8 + $0x1a8] sm:$0xf]  ;;  %v5156_v46 = vpop.f32.mrf.mxu1  ;;  %v4692_v28 = vld [vmem:[#allocation8 + $0x134] sm:$0xf0] }
 0x11d   :  { %2511 = vmatpush.bf16.msrb.mxu0 %v4284_v31  ;;  %v4036_v57 = vor.u32 %v4708_v6, %v4035_v16  ;;  %v4203_v36 = vld [vmem:[#allocation8 + $0x300] sm:$0xf]  ;;  %v330_v16 = vperm.slane %v5124_v2, 2 }
 0x11e   :  { %2528 = vmatpush.bf16.msra.mxu3 %v3840_v39  ;;  %v4052_v39 = vor.u32 %v4712_v27, %v4051_v26  ;;  %v3828_v26 = vor.u32 %v4656_v14, %v3827_v11  ;;  %v3971_v27 = vld [vmem:[#allocation8 + $0x128] sm:$0xf]  ;;  %v4666_v11 = vld [vmem:[#allocation8 + $0x6c] sm:$0xf]  ;;  %v4765_v14 = vld [vmem:[#allocation8 + $0x384] sm:$0xf] }
 0x120   :  { %2542 = vmatpush.bf16.msra.mxu1 %v3952_v35  ;;  %2552 = vmatpush.bf16.msra.mxu2 %v4128_v41  ;;  %v4252_v35 = vor.u32 %v4763_v54, %v4251_v25  ;;  %v4301_v25 = vld [vmem:[#allocation8 + $0x3d0] sm:$0xf0]  ;;  %v1512_v54 = vadd.f32 %v5156_v46, %v330_v16  ;;  %v4053_v46 = vld [vmem:[#allocation8 + $0x1d8] sm:$0xf0]  ;;  %v4698_v16 = vld [vmem:[#allocation8 + $0x16c] sm:$0xf] }
 0x121   :  { %2512 = vmatpush.bf16.msrb.mxu0 %v4268_v44  ;;  %v4320_v44 = vor.u32 %v4777_v42, %v4317_v43  ;;  %v4237_v42 = vld [vmem:[#allocation8 + $0x350] sm:$0xf0] }
 0x122   :  { %2529 = vmatpush.bf16.msra.mxu3 %v3824_v53  ;;  %v4112_v53 = vor.u32 %v4725_v49, %v4109_v50  ;;  %v3955_v49 = vld [vmem:[#allocation8 + $0x108] sm:$0xf]  ;;  %v4688_v50 = vld [vmem:[#allocation8 + $0x114] sm:$0xf0] }
 0x123   :  { %v1539_v63 = vpop.f32.mrf.mxu0 }
 0x124   :  { %2587 = vmatpush.bf16.msrb.mxu1 %v4068_v21  ;;  %2553 = vmatpush.bf16.msra.mxu2 %v4112_v53  ;;  %v1513_v12 = vpop.f32.mrf.mxu1  ;;  %v4696_v21 = vld [vmem:[#allocation8 + $0x154] sm:$0xf0]  ;;  %v4773_v53 = vld [vmem:[#allocation8 + $0x3c4] sm:$0xf] }
 0x125   :  { %2530 = vmatmul.bf16.vlgmr.msra.gmra.mxu3 %v5144_v51  ;;  %2513 = vmatpush.bf16.msrb.mxu0 %v4252_v35  ;;  %v3988_v31 = vor.u32 %v4696_v21, %v3987_v17  ;;  %v4304_v35 = vor.u32 %v4773_v53, %v4301_v25  ;;  %v4056_v12 = vor.u32 %v4710_v5, %v4053_v46  ;;  %v4037_v17 = vld [vmem:[#allocation8 + $0x1b8] sm:$0xf0]  ;;  %v4753_v25 = vld [vmem:[#allocation8 + $0x324] sm:$0xf]  ;;  %v4205_v5 = vld [vmem:[#allocation8 + $0x310] sm:$0xf0] }
 0x126   :  { %2574 = vmatpush.bf16.msrb.mxu3 %v3940_v30  ;;  %v4019_v30 = vld [vmem:[#allocation8 + $0x188] sm:$0xf]  ;;  %v3861_v21 = vld [vmem:[#allocation8 + $0x58] sm:$0xf0]  ;;  %v4690_v46 = vld [vmem:[#allocation8 + $0x12c] sm:$0xf] }
 0x127   :  { %v4020_v0 = vor.u32 %v4704_v56, %v4019_v30  ;;  %v5160_v10 = vpop.f32.mrf.mxu2  ;;  %v4714_v30 = vld [vmem:[#allocation8 + $0x1ec] sm:$0xf]  ;;  %v4069_v56 = vld [vmem:[#allocation8 + $0x1f8] sm:$0xf0] }
 0x128   :  { %2588 = vmatpush.bf16.msrb.mxu1 %v4052_v39  ;;  %v5158_v62 = vpop.f32.mrf.mxu3  ;;  %v4751_v39 = vld [vmem:[#allocation8 + $0x30c] sm:$0xf0]  ;;  %v4072_v63 = vor.u32 %v4714_v30, %v4069_v56  ;;  %v3829_v53 = vld [vmem:[#allocation8 + $0x18] sm:$0xf0]  ;;  %v4694_v56 = vld [vmem:[#allocation8 + $0x14c] sm:$0xf] }
 0x129   :  { %2514 = vmatpush.bf16.msrb.mxu0 %v4236_v9  ;;  %v4204_v41 = vor.u32 %v4751_v39, %v4203_v36  ;;  %v1525_v4 = vadd.f32 %v5158_v62, %v1512_v54  ;;  %v4221_v54 = vld [vmem:[#allocation8 + $0x330] sm:$0xf0] }
 0x12a   :  { %2575 = vmatpush.bf16.msrb.mxu3 %v3924_v3  ;;  %v4096_v3 = vor.u32 %v4721_v60, %v4093_v61  ;;  %v4670_v60 = vld [vmem:[#allocation8 + $0x8c] sm:$0xf] }
 0x12b   :  { %2543 = vmatmul.bf16.vlgmr.msra.gmra.mxu1 %v5151_v7  ;;  %v5163_v34 = vpop.f32.mrf.mxu0 }
 0x12c   :  { %2589 = vmatpush.bf16.msrb.mxu1 %v4036_v57  ;;  %2554 = vmatpush.bf16.msra.mxu2 %v4096_v3  ;;  %v4674_v57 = vld [vmem:[#allocation8 + $0xac] sm:$0xf]  ;;  %v4285_v3 = vld [vmem:[#allocation8 + $0x3b0] sm:$0xf0] }
 0x12d   :  { %2515 = vmatpush.bf16.msrb.mxu0 %v4220_v24  ;;  %v3912_v59 = vor.u32 %v4674_v57, %v3909_v52  ;;  %v4288_v37 = vor.u32 %v4769_v1, %v4285_v3  ;;  %v4654_v57 = vld [vmem:[#allocation8 + $0xc] sm:$0xf] }
 0x12e   :  { %2576 = vmatpush.bf16.msrb.mxu3 %v3908_v18  ;;  %v4080_v18 = vor.u32 %v4717_v15, %v4077_v55  ;;  %v4269_v15 = vld [vmem:[#allocation8 + $0x390] sm:$0xf0]  ;;  %v1538_v55 = vadd.f32 %v5154_v38, %v1525_v4  ;;  %v4749_v4 = vld [vmem:[#allocation8 + $0x304] sm:$0xf] }
 0x12f   :  { %v1552_v6 = vpop.f32.mrf.mxu2  ;;  %v4272_v62 = vor.u32 %v4765_v14, %v4269_v15  ;;  %v4686_v15 = vld [vmem:[#allocation8 + $0x10c] sm:$0xf] }
 0x130   :  { %2590 = vmatpush.bf16.msrb.mxu1 %v4020_v0  ;;  %v1526_v33 = vpop.f32.mrf.mxu3  ;;  %2555 = vmatpush.bf16.msra.mxu2 %v4080_v18  ;;  %v3893_v0 = vld [vmem:[#allocation8 + $0x98] sm:$0xf0]  ;;  %v1551_v24 = vadd.f32 %v5160_v10, %v1538_v55 }
 0x131   :  { %2516 = vmatpush.bf16.msrb.mxu0 %v4204_v41  ;;  %v3896_v9 = vor.u32 %v4670_v60, %v3893_v0  ;;  %v4658_v33 = vld [vmem:[#allocation8 + $0x2c] sm:$0xf]  ;;  %v4757_v41 = vld [vmem:[#allocation8 + $0x344] sm:$0xf]  ;;  %v4005_v10 = vld [vmem:[#allocation8 + $0x178] sm:$0xf0] }
 0x132   :  { %2577 = vmatpush.bf16.msrb.mxu3 %v3892_v29  ;;  %v3944_v29 = vor.u32 %v4682_v22, %v3941_v23  ;;  %v4761_v22 = vld [vmem:[#allocation8 + $0x364] sm:$0xf]  ;;  %v4253_v23 = vld [vmem:[#allocation8 + $0x370] sm:$0xf0]  ;;  %v4008_v52 = vor.u32 %v4698_v16, %v4005_v10  ;;  %v4744_v0 = vld [vmem:[#allocation8 + $0x2d4] sm:$0xf0] }
 0x133   :  { %v1591_v61 = vpop.f32.mrf.mxu0  ;;  %v4256_v38 = vor.u32 %v4761_v22, %v4253_v23  ;;  %v3957_v55 = vld [vmem:[#allocation8 + $0x118] sm:$0xf0]  ;;  %v4732_v22 = vld [vmem:[#allocation8 + $0x274] sm:$0xf0]  ;;  %v4746_v10 = vld [vmem:[#allocation8 + $0x2ec] sm:$0xf] }
 0x134   :  { %2591 = vmatpush.bf16.msrb.mxu1 %v4004_v45  ;;  %v4706_v45 = vld [vmem:[#allocation8 + $0x1ac] sm:$0xf] }
 0x135   :  { %2561 = vmatpush.bf16.msra.mxu0 %v4320_v44  ;;  %v4040_v20 = vor.u32 %v4706_v45, %v4037_v17  ;;  %v4240_v44 = vor.u32 %v4757_v41, %v4237_v42  ;;  %v4147_v17 = vld [vmem:[#allocation8 + $0x288] sm:$0xf] }
 0x136   :  { %2578 = vmatpush.bf16.msrb.mxu3 %v3876_v47  ;;  %v3972_v47 = vor.u32 %v4692_v28, %v3971_v27  ;;  %v4021_v27 = vld [vmem:[#allocation8 + $0x198] sm:$0xf0] }
 0x138   :  { %2592 = vmatpush.bf16.msrb.mxu1 %v3988_v31 }
 0x139   :  { %2562 = vmatpush.bf16.msra.mxu0 %v4304_v35  ;;  %v3989_v35 = vld [vmem:[#allocation8 + $0x158] sm:$0xf0] }
 0x13a   :  { %2579 = vmatpush.bf16.msrb.mxu3 %v3860_v58  ;;  %v3956_v58 = vor.u32 %v4688_v50, %v3955_v49  ;;  %v4195_v49 = vld [vmem:[#allocation8 + $0x2e8] sm:$0xf]  ;;  %v4748_v50 = vld [vmem:[#allocation8 + $0x2f4] sm:$0xf0]  ;;  %v3992_v1 = vor.u32 %v4694_v56, %v3989_v35 }
 0x13b   :  { %v4196_v60 = vor.u32 %v4748_v50, %v4195_v49  ;;  %v4742_v50 = vld [vmem:[#allocation8 + $0x2cc] sm:$0xf] }
 0x13c   :  { %2593 = vmatpush.bf16.msrb.mxu1 %v3972_v47  ;;  %v1563_v8 = vpop.f32.mrf.mxu1 }
 0x13d   :  { %2563 = vmatpush.bf16.msra.mxu0 %v4288_v37  ;;  %v1564_v31 = vadd.f32 %v1563_v8, %v1551_v24  ;;  %v3973_v37 = vld [vmem:[#allocation8 + $0x138] sm:$0xf0] }
 0x13e   :  { %2580 = vmatpush.bf16.msrb.mxu3 %v3844_v13  ;;  %v3877_v13 = vld [vmem:[#allocation8 + $0x78] sm:$0xf0]  ;;  %v3976_v14 = vor.u32 %v4690_v46, %v3973_v37  ;;  %v4291_v37 = vld [vmem:[#allocation8 + $0x3a8] sm:$0xf] }
 0x13f   :  { %v3880_v18 = vor.u32 %v4666_v11, %v3877_v13  ;;  %v5172_v28 = vpop.f32.mrf.mxu0  ;;  %v4740_v13 = vld [vmem:[#allocation8 + $0x2b4] sm:$0xf0]  ;;  %v4149_v46 = vld [vmem:[#allocation8 + $0x298] sm:$0xf0] }
 0x140   :  { %2594 = vmatpush.bf16.msrb.mxu1 %v3956_v58 }
 0x141   :  { %2564 = vmatpush.bf16.msra.mxu0 %v4272_v62  ;;  %v4736_v62 = vld [vmem:[#allocation8 + $0x294] sm:$0xf0] }
 0x142   :  { %2581 = vmatpush.bf16.msrb.mxu3 %v3828_v26  ;;  %v4702_v26 = vld [vmem:[#allocation8 + $0x18c] sm:$0xf] }
 0x143   :  { %2595 = vmatmul.bf16.vlgmr.msrb.gmra.mxu1 %v5151_v7  ;;  %v4024_v39 = vor.u32 %v4702_v26, %v4021_v27  ;;  %v4115_v27 = vld [vmem:[#allocation8 + $0x248] sm:$0xf] }
 0x144   :  { %2639 = vmatpush.bf16.msra.mxu1 %v4072_v63  ;;  %v1565_v32 = vpop.f32.mrf.mxu1  ;;  %v4179_v63 = vld [vmem:[#allocation8 + $0x2c8] sm:$0xf] }
 0x145   :  { %2582 = vmatmul.bf16.vlgmr.msrb.gmra.mxu3 %v5144_v51  ;;  %2565 = vmatpush.bf16.msra.mxu0 %v4256_v38  ;;  %v4180_v11 = vor.u32 %v4744_v0, %v4179_v63  ;;  %v4724_v32 = vld [vmem:[#allocation8 + $0x234] sm:$0xf0]  ;;  %v4307_v63 = vld [vmem:[#allocation8 + $0x3c8] sm:$0xf] }
 0x146   :  { %2626 = vmatpush.bf16.msra.mxu3 %v3944_v29  ;;  %v3864_v29 = vor.u32 %v4662_v19, %v3861_v21  ;;  %v3960_v19 = vor.u32 %v4686_v15, %v3957_v55  ;;  %v4131_v21 = vld [vmem:[#allocation8 + $0x268] sm:$0xf]  ;;  %v4776_v0 = vld [vmem:[#allocation8 + $0x3d4] sm:$0xf0] }
 0x147   :  { %v1602_v6 = vpop.f32.mrf.mxu2  ;;  %v1617_v58 = vpop.f32.mrf.mxu0  ;;  %v4132_v26 = vor.u32 %v4732_v22, %v4131_v21  ;;  %v4768_v15 = vld [vmem:[#allocation8 + $0x394] sm:$0xf0]  ;;  %v4722_v22 = vld [vmem:[#allocation8 + $0x22c] sm:$0xf] }
 0x148   :  { %2640 = vmatpush.bf16.msra.mxu1 %v4056_v12  ;;  %v1576_v36 = vpop.f32.mrf.mxu3  ;;  %v4163_v12 = vld [vmem:[#allocation8 + $0x2a8] sm:$0xf] }
 0x149   :  { %v1577_v43 = vadd.f32 %v1576_v36, %v1564_v31  ;;  %2566 = vmatpush.bf16.msra.mxu0 %v4240_v44  ;;  %v4164_v45 = vor.u32 %v4740_v13, %v4163_v12  ;;  %v4730_v12 = vld [vmem:[#allocation8 + $0x26c] sm:$0xf]  ;;  %v4133_v13 = vld [vmem:[#allocation8 + $0x278] sm:$0xf0] }
 0x14a   :  { %2627 = vmatpush.bf16.msra.mxu3 %v3928_v48  ;;  %v3848_v48 = vor.u32 %v4658_v33, %v3845_v40  ;;  %v4136_v55 = vor.u32 %v4730_v12, %v4133_v13 }
 0x14b   :  { %v1590_v47 = vadd.f32 %v5163_v34, %v1577_v43  ;;  %v3832_v34 = vor.u32 %v4654_v57, %v3829_v53  ;;  %v4083_v43 = vld [vmem:[#allocation8 + $0x208] sm:$0xf]  ;;  %v4181_v57 = vld [vmem:[#allocation8 + $0x2d8] sm:$0xf0] }
 0x14c   :  { %2641 = vmatpush.bf16.msra.mxu1 %v4040_v20  ;;  %v4148_v20 = vor.u32 %v4736_v62, %v4147_v17  ;;  %v4184_v35 = vor.u32 %v4742_v50, %v4181_v57  ;;  %v4726_v17 = vld [vmem:[#allocation8 + $0x24c] sm:$0xf]  ;;  %v4117_v62 = vld [vmem:[#allocation8 + $0x258] sm:$0xf0]  ;;  %v5190_v57 = vld [vmem:[#allocation10] sm:$0xf] }
 0x14d   :  { %v1686_v30 = vmax.f32 %v1590_v47, 0.0  ;;  %v4277_v50 = vld [vmem:[#allocation8 + $0x398] sm:$0xf0] }
 0x14e   :  { %2628 = vmatpush.bf16.msra.mxu3 %v3912_v59  ;;  %v4224_v59 = vor.u32 %v4753_v25, %v4221_v54  ;;  %v4323_v25 = vld [vmem:[#allocation8 + $0x3e8] sm:$0xf]  ;;  %v4780_v54 = vld [vmem:[#allocation8 + $0x3f4] sm:$0xf0] }
 0x14f   :  { %v5175_v61 = vpack.c.bf16 %v1686_v30, %v1686_v30  ;;  %v1604_v8 = vpop.f32.mrf.mxu2  ;;  %v4324_v58 = vor.u32 %v4780_v54, %v4323_v25  ;;  %v4261_v25 = vld [vmem:[#allocation8 + $0x378] sm:$0xf0] }
 0x150   :  { %2642 = vmatpush.bf16.msra.mxu1 %v4024_v39  ;;  %v1578_v3 = vpop.f32.mrf.mxu3  ;;  %2567 = vmatpush.bf16.msra.mxu0 %v4224_v59  ;;  %v4738_v59 = vld [vmem:[#allocation8 + $0x2ac] sm:$0xf]  ;;  %v4772_v8 = vld [vmem:[#allocation8 + $0x3b4] sm:$0xf0] }
 0x151   :  { %2504 = vmatmul.bf16.vlgmr.msrb.gmra.mxu2 %v5175_v61 }
 0x152   :  { %2629 = vmatpush.bf16.msra.mxu3 %v3896_v9  ;;  %v4208_v9 = vor.u32 %v4749_v4, %v4205_v5  ;;  %2600 = vmatpush.bf16.msrb.mxu2 %v4196_v60  ;;  %v4165_v60 = vld [vmem:[#allocation8 + $0x2b8] sm:$0xf0]  ;;  %v4308_v4 = vor.u32 %v4776_v0, %v4307_v63  ;;  %v4734_v5 = vld [vmem:[#allocation8 + $0x28c] sm:$0xf] }
 0x153   :  { %v4754_v0 = vld [vmem:[#allocation8 + $0x32c] sm:$0xf] }
 0x154   :  { %2643 = vmatpush.bf16.msra.mxu1 %v4008_v52  ;;  %2568 = vmatpush.bf16.msra.mxu0 %v4208_v9  ;;  %v4152_v9 = vor.u32 %v4734_v5, %v4149_v46  ;;  %v4213_v5 = vld [vmem:[#allocation8 + $0x318] sm:$0xf0] }
 0x156   :  { %2630 = vmatpush.bf16.msra.mxu3 %v3880_v18  ;;  %2601 = vmatpush.bf16.msrb.mxu2 %v4180_v11  ;;  %v331_v18 = vperm.slane %v5124_v2, 3  ;;  %v4292_v11 = vor.u32 %v4772_v8, %v4291_v37 }
 0x158   :  { %2644 = vmatpush.bf16.msra.mxu1 %v3992_v1  ;;  %v1603_v23 = vadd.f32 %v1602_v6, %v331_v18  ;;  %v4197_v6 = vld [vmem:[#allocation8 + $0x2f8] sm:$0xf0]  ;;  %v4168_v1 = vor.u32 %v4738_v59, %v4165_v60  ;;  %v4259_v18 = vld [vmem:[#allocation8 + $0x368] sm:$0xf] }
 0x15a   :  { %2631 = vmatpush.bf16.msra.mxu3 %v3864_v29  ;;  %2602 = vmatpush.bf16.msrb.mxu2 %v4164_v45  ;;  %v1616_v38 = vadd.f32 %v5172_v28, %v1603_v23  ;;  %v4099_v29 = vld [vmem:[#allocation8 + $0x228] sm:$0xf]  ;;  %v4101_v23 = vld [vmem:[#allocation8 + $0x238] sm:$0xf0] }
 0x15b   :  { %v4100_v42 = vor.u32 %v4724_v32, %v4099_v29  ;;  %v4227_v29 = vld [vmem:[#allocation8 + $0x328] sm:$0xf]  ;;  %v4756_v32 = vld [vmem:[#allocation8 + $0x334] sm:$0xf0] }
 0x15c   :  { %2645 = vmatpush.bf16.msra.mxu1 %v3976_v14  ;;  %v1628_v24 = vpop.f32.mrf.mxu1  ;;  %v4275_v14 = vld [vmem:[#allocation8 + $0x388] sm:$0xf] }
 0x15d   :  { %v1629_v33 = vadd.f32 %v1628_v24, %v1616_v38  ;;  %v4276_v45 = vor.u32 %v4768_v15, %v4275_v14  ;;  %v4243_v24 = vld [vmem:[#allocation8 + $0x348] sm:$0xf]  ;;  %v4788_v14 = vld [vmem:[#allocation11 + $0x38] sm:$0xff] }
 0x15e   :  { %2632 = vmatpush.bf16.msra.mxu3 %v3848_v48  ;;  %2603 = vmatpush.bf16.msrb.mxu2 %v4148_v20  ;;  %v4200_v48 = vor.u32 %v4746_v10, %v4197_v6  ;;  %v4120_v20 = vor.u32 %v4726_v17, %v4117_v62  ;;  %v4774_v10 = vld [vmem:[#allocation8 + $0x3cc] sm:$0xf]  ;;  %v4309_v6 = vld [vmem:[#allocation8 + $0x3d8] sm:$0xf0] }
 0x15f   :  { %v1667_v2 = vpop.f32.mrf.mxu0 }
 0x160   :  { %2646 = vmatpush.bf16.msra.mxu1 %v3960_v19  ;;  %v4764_v19 = vld [vmem:[#allocation8 + $0x374] sm:$0xf0] }
 0x161   :  { %2556 = vmatmul.bf16.vlgmr.msra.gmra.mxu2 %v5175_v61  ;;  %v4260_v21 = vor.u32 %v4764_v19, %v4259_v18  ;;  %v4786_v18 = vld [vmem:[#allocation11 + $0x28] sm:$0xff] }
 0x162   :  { %2633 = vmatpush.bf16.msra.mxu3 %v3832_v34  ;;  %2604 = vmatpush.bf16.msrb.mxu2 %v4132_v26  ;;  %v4760_v26 = vld [vmem:[#allocation8 + $0x354] sm:$0xf0] }
 0x163   :  { %2647 = vmatmul.bf16.vlgmr.msra.gmra.mxu1 %v5151_v7  ;;  %v4720_v7 = vld [vmem:[#allocation8 + $0x214] sm:$0xf0]  ;;  %v4244_v38 = vor.u32 %v4760_v26, %v4243_v24  ;;  %v4796_v24 = vld [vmem:[#allocation11 + $0x78] sm:$0xff] }
 0x164   :  { %v1630_v36 = vpop.f32.mrf.mxu1  ;;  %v4084_v47 = vor.u32 %v4720_v7, %v4083_v43  ;;  %v4325_v43 = vld [vmem:[#allocation8 + $0x3f8] sm:$0xf0]  ;;  %2959 = vmatpush.bf16.msrb.mxu1 %v4796_v24  ;;  %v4783_v26 = vld [vmem:[#allocation11 + $0x10] sm:$0xff] }
 0x165   :  { %2634 = vmatmul.bf16.vlgmr.msra.gmra.mxu3 %v5144_v51  ;;  %v4728_v51 = vld [vmem:[#allocation8 + $0x254] sm:$0xf0]  ;;  %v4228_v36 = vor.u32 %v4756_v32, %v4227_v29  ;;  %v1825_v32 = vperm.slane %v5190_v57, 3 }
 0x166   :  { %v4116_v31 = vor.u32 %v4728_v51, %v4115_v27  ;;  %v4104_v51 = vor.u32 %v4722_v22, %v4101_v23  ;;  %2946 = vmatpush.bf16.msrb.mxu3 %v4788_v14  ;;  %v4784_v23 = vld [vmem:[#allocation11 + $0x18] sm:$0xff]  ;;  %v4806_v14 = vld [vmem:[#allocation11 + $0xc8] sm:$0xff] }
 0x167   :  { %v1654_v41 = vpop.f32.mrf.mxu2  ;;  %v1669_v28 = vpop.f32.mrf.mxu0 }
 0x168   :  { %v1641_v39 = vpop.f32.mrf.mxu3  ;;  %2605 = vmatpush.bf16.msrb.mxu2 %v4116_v31  ;;  %v4085_v31 = vld [vmem:[#allocation8 + $0x218] sm:$0xf0]  ;;  %v4312_v28 = vor.u32 %v4774_v10, %v4309_v6  ;;  %v4790_v10 = vld [vmem:[#allocation11 + $0x48] sm:$0xff] }
 0x169   :  { %v1642_v40 = vadd.f32 %v1641_v39, %v1629_v33  ;;  %v4211_v39 = vld [vmem:[#allocation8 + $0x308] sm:$0xf]  ;;  %v4802_v6 = vld [vmem:[#allocation11 + $0xa8] sm:$0xff] }
 0x16b   :  { %v1655_v16 = vadd.f32 %v1654_v41, %v1642_v40  ;;  %v4752_v40 = vld [vmem:[#allocation8 + $0x314] sm:$0xf0] }
 0x16c   :  { %2606 = vmatpush.bf16.msrb.mxu2 %v4100_v42  ;;  %v1680_v49 = vpop.f32.mrf.mxu1  ;;  %v4778_v42 = vld [vmem:[#allocation8 + $0x3ec] sm:$0xf]  ;;  %v4212_v7 = vor.u32 %v4752_v40, %v4211_v39 }
 0x16d   :  { %v1668_v44 = vadd.f32 %v1667_v2, %v1655_v16  ;;  %v4718_v2 = vld [vmem:[#allocation8 + $0x20c] sm:$0xf]  ;;  %v4328_v16 = vor.u32 %v4778_v42, %v4325_v43  ;;  %v4803_v42 = vld [vmem:[#allocation11 + $0xb0] sm:$0xff] }
 0x16e   :  { %v4088_v33 = vor.u32 %v4718_v2, %v4085_v31  ;;  %v4781_v2 = vld [vmem:[#allocation11] sm:$0xff] }
 0x16f   :  { %v1681_v52 = vadd.f32 %v1680_v49, %v1668_v44  ;;  %v1656_v30 = vpop.f32.mrf.mxu2  ;;  %v4770_v44 = vld [vmem:[#allocation8 + $0x3ac] sm:$0xf]  ;;  %v4793_v31 = vld [vmem:[#allocation11 + $0x60] sm:$0xff] }
 0x170   :  { %v1643_v53 = vpop.f32.mrf.mxu3  ;;  %2607 = vmatpush.bf16.msrb.mxu2 %v4084_v47  ;;  %v4293_v47 = vld [vmem:[#allocation8 + $0x3b8] sm:$0xf0]  ;;  %v4766_v49 = vld [vmem:[#allocation8 + $0x38c] sm:$0xf] }
 0x171   :  { %v1687_v56 = vmax.f32 %v1681_v52, 0.0  ;;  %v4280_v52 = vor.u32 %v4766_v49, %v4277_v50  ;;  %v1822_v53 = vperm.slane %v5190_v57, 0  ;;  %v4800_v50 = vld [vmem:[#allocation11 + $0x98] sm:$0xff] }
 0x173   :  { %v5183_v34 = vpack.c.bf16 %v1687_v56, %v1687_v56  ;;  %2608 = vmatmul.bf16.vlgmr.msrb.gmra.mxu2 %v5175_v61  ;;  %v4758_v56 = vld [vmem:[#allocation8 + $0x34c] sm:$0xf] }
 0x174   :  { %2652 = vmatpush.bf16.msra.mxu2 %v4200_v48  ;;  %v1682_v3 = vpop.f32.mrf.mxu1  ;;  %v4296_v48 = vor.u32 %v4770_v44, %v4293_v47  ;;  %v4789_v44 = vld [vmem:[#allocation11 + $0x40] sm:$0xff] }
 0x175   :  { %2517 = vmatmul.bf16.vlgmr.msrb.gmra.mxu0 %v5183_v34  ;;  %v4801_v47 = vld [vmem:[#allocation11 + $0xa0] sm:$0xff] }
 0x176   :  { %2613 = vmatpush.bf16.msrb.mxu0 %v4324_v58 }
 0x178   :  { %2653 = vmatpush.bf16.msra.mxu2 %v4184_v35  ;;  %v4245_v35 = vld [vmem:[#allocation8 + $0x358] sm:$0xf0] }
 0x179   :  { %v4248_v63 = vor.u32 %v4758_v56, %v4245_v35  ;;  %v4797_v56 = vld [vmem:[#allocation11 + $0x80] sm:$0xff]  ;;  %v4812_v35 = vld [vmem:[#allocation11 + $0xf8] sm:$0xff] }
 0x17a   :  { %2614 = vmatpush.bf16.msrb.mxu0 %v4308_v4  ;;  %v4750_v4 = vld [vmem:[#allocation8 + $0x30c] sm:$0xf] }
 0x17b   :  { %v4216_v8 = vor.u32 %v4750_v4, %v4213_v5  ;;  %v4809_v4 = vld [vmem:[#allocation11 + $0xe0] sm:$0xff] }
 0x17c   :  { %2654 = vmatpush.bf16.msra.mxu2 %v4168_v1  ;;  %v4229_v1 = vld [vmem:[#allocation8 + $0x338] sm:$0xf0] }
 0x17d   :  { %v4232_v3 = vor.u32 %v4754_v0, %v4229_v1  ;;  %v4810_v1 = vld [vmem:[#allocation11 + $0xe8] sm:$0xff] }
 0x17e   :  { %2615 = vmatpush.bf16.msrb.mxu0 %v4292_v11 }
 0x180   :  { %2655 = vmatpush.bf16.msra.mxu2 %v4152_v9  ;;  %v1823_v9 = vperm.slane %v5190_v57, 1 }
 0x182   :  { %2616 = vmatpush.bf16.msrb.mxu0 %v4276_v45  ;;  %v4787_v45 = vld [vmem:[#allocation11 + $0x30] sm:$0xff] }
 0x183   :  { %2947 = vmatpush.bf16.msrb.mxu3 %v4787_v45 }
 0x184   :  { %2656 = vmatpush.bf16.msra.mxu2 %v4136_v55  ;;  %v1824_v55 = vperm.slane %v5190_v57, 2  ;;  %v4799_v57 = vld [vmem:[#allocation11 + $0x90] sm:$0xff] }
 0x185   :  { %2569 = vmatmul.bf16.vlgmr.msra.gmra.mxu0 %v5183_v34 }
 0x186   :  { %2617 = vmatpush.bf16.msrb.mxu0 %v4260_v21  ;;  %v4785_v21 = vld [vmem:[#allocation11 + $0x20] sm:$0xff] }
 0x187   :  { %2948 = vmatpush.bf16.msrb.mxu3 %v4786_v18 }
 0x188   :  { %v2479_v27 = vpop.f32.mrf.mxu3  ;;  %2657 = vmatpush.bf16.msra.mxu2 %v4120_v20 }
 0x189   :  { %v2480_v30 = vadd.f32 %v2479_v27, %v1822_v53  ;;  %v4795_v27 = vld [vmem:[#allocation11 + $0x70] sm:$0xff] }
 0x18a   :  { %2618 = vmatpush.bf16.msrb.mxu0 %v4244_v38  ;;  %2960 = vmatpush.bf16.msrb.mxu1 %v4795_v27  ;;  %v4794_v38 = vld [vmem:[#allocation11 + $0x68] sm:$0xff] }
 0x18b   :  { %2949 = vmatpush.bf16.msrb.mxu3 %v4785_v21 }
 0x18c   :  { %2658 = vmatpush.bf16.msra.mxu2 %v4104_v51  ;;  %v4782_v51 = vld [vmem:[#allocation11 + $0x8] sm:$0xff] }
 0x18e   :  { %2619 = vmatpush.bf16.msrb.mxu0 %v4228_v36  ;;  %2961 = vmatpush.bf16.msrb.mxu1 %v4794_v38  ;;  %v4804_v36 = vld [vmem:[#allocation11 + $0xb8] sm:$0xff] }
 0x18f   :  { %2950 = vmatpush.bf16.msrb.mxu3 %v4784_v23 }
 0x190   :  { %v2481_v41 = vpop.f32.mrf.mxu3  ;;  %2659 = vmatpush.bf16.msra.mxu2 %v4088_v33  ;;  %v4792_v33 = vld [vmem:[#allocation11 + $0x58] sm:$0xff] }
 0x191   :  { %v4791_v41 = vld [vmem:[#allocation11 + $0x50] sm:$0xff] }
 0x192   :  { %2620 = vmatpush.bf16.msrb.mxu0 %v4212_v7  ;;  %2962 = vmatpush.bf16.msrb.mxu1 %v4793_v31 }
 0x193   :  { %2660 = vmatmul.bf16.vlgmr.msra.gmra.mxu2 %v5175_v61  ;;  %v4762_v61 = vld [vmem:[#allocation8 + $0x36c] sm:$0xf]  ;;  %2951 = vmatpush.bf16.msrb.mxu3 %v4783_v26 }
 0x194   :  { %v4264_v54 = vor.u32 %v4762_v61, %v4261_v25  ;;  %2972 = vmatpush.bf16.msrb.mxu2 %v4804_v36  ;;  %v4798_v61 = vld [vmem:[#allocation11 + $0x88] sm:$0xff] }
 0x195   :  { %2621 = vmatmul.bf16.vlgmr.msrb.gmra.mxu0 %v5183_v34 }
 0x196   :  { %2665 = vmatpush.bf16.msra.mxu0 %v4328_v16  ;;  %2963 = vmatpush.bf16.msrb.mxu1 %v4792_v33 }
 0x197   :  { %2952 = vmatpush.bf16.msrb.mxu3 %v4782_v51 }
 0x198   :  { %v2492_v58 = vpop.f32.mrf.mxu1  ;;  %2973 = vmatpush.bf16.msrb.mxu2 %v4803_v42 }
 0x199   :  { %v5193_v60 = vadd.f32 %v2492_v58, %v2480_v30 }
 0x19a   :  { %2666 = vmatpush.bf16.msra.mxu0 %v4312_v28  ;;  %2964 = vmatpush.bf16.msrb.mxu1 %v4791_v41 }
 0x19b   :  { %2953 = vmatpush.bf16.msrb.mxu3 %v4781_v2 }
 0x19c   :  { %2974 = vmatpush.bf16.msrb.mxu2 %v4802_v6 }
 0x19e   :  { %2667 = vmatpush.bf16.msra.mxu0 %v4296_v48  ;;  %2965 = vmatpush.bf16.msrb.mxu1 %v4790_v10 }
 0x1a0   :  { %v2494_v46 = vpop.f32.mrf.mxu1  ;;  %2975 = vmatpush.bf16.msrb.mxu2 %v4801_v47 }
 0x1a2   :  { %2668 = vmatpush.bf16.msra.mxu0 %v4280_v52  ;;  %2966 = vmatpush.bf16.msrb.mxu1 %v4789_v44 }
 0x1a4   :  { %2976 = vmatpush.bf16.msrb.mxu2 %v4800_v50 }
 0x1a6   :  { %2669 = vmatpush.bf16.msra.mxu0 %v4264_v54 }
 0x1a8   :  { %v2531_v59 = vpop.f32.mrf.mxu3  ;;  %v2544_v12 = vpop.f32.mrf.mxu1  ;;  %2977 = vmatpush.bf16.msrb.mxu2 %v4799_v57 }
 0x1a9   :  { %v2532_v11 = vadd.f32 %v2531_v59, %v1823_v9 }
 0x1aa   :  { %2670 = vmatpush.bf16.msra.mxu0 %v4248_v63  ;;  %v4811_v63 = vld [vmem:[#allocation11 + $0xf0] sm:$0xff] }
 0x1ab   :  { %v5196_v13 = vadd.f32 %v2544_v12, %v2532_v11  ;;  %v4807_v11 = vld [vmem:[#allocation11 + $0xd0] sm:$0xff] }
 0x1ac   :  { %2978 = vmatpush.bf16.msrb.mxu2 %v4798_v61 }
 0x1ae   :  { %2671 = vmatpush.bf16.msra.mxu0 %v4232_v3 }
 0x1b0   :  { %v2533_v37 = vpop.f32.mrf.mxu3  ;;  %v2546_v15 = vpop.f32.mrf.mxu1  ;;  %2979 = vmatpush.bf16.msrb.mxu2 %v4797_v56 }
 0x1b1   :  { %v4808_v37 = vld [vmem:[#allocation11 + $0xd8] sm:$0xff] }
 0x1b2   :  { %2672 = vmatpush.bf16.msra.mxu0 %v4216_v8 }
 0x1b5   :  { %2673 = vmatmul.bf16.vlgmr.msra.gmra.mxu0 %v5183_v34 }
 0x1b6   :  { %2985 = vmatpush.bf16.msrb.mxu0 %v4812_v35 }
 0x1ba   :  { %2986 = vmatpush.bf16.msrb.mxu0 %v4811_v63 }
 0x1be   :  { %2987 = vmatpush.bf16.msrb.mxu0 %v4810_v1 }
 0x1c0   :  { %v2596_v19 = vpop.f32.mrf.mxu1 }
 0x1c2   :  { %2988 = vmatpush.bf16.msrb.mxu0 %v4809_v4 }
 0x1c6   :  { %2989 = vmatpush.bf16.msrb.mxu0 %v4808_v37 }
 0x1c8   :  { %v2583_v17 = vpop.f32.mrf.mxu3  ;;  %v2598_v34 = vpop.f32.mrf.mxu1 }
 0x1c9   :  { %v2584_v62 = vadd.f32 %v2583_v17, %v1824_v55  ;;  %v4805_v55 = vld [vmem:[#allocation11 + $0xc0] sm:$0xff] }
 0x1ca   :  { %2990 = vmatpush.bf16.msrb.mxu0 %v4807_v11 }
 0x1cb   :  { %v5200_v20 = vadd.f32 %v2596_v19, %v2584_v62 }
 0x1ce   :  { %2991 = vmatpush.bf16.msrb.mxu0 %v4806_v14 }
 0x1d0   :  { %v2585_v22 = vpop.f32.mrf.mxu3 }
 0x1d2   :  { %2992 = vmatpush.bf16.msrb.mxu0 %v4805_v55 }
 0x1d4   :  { %v2505_v29 = vpop.f32.mrf.mxu2 }
 0x1d5   :  { %v2506_v53 = vadd.f32 %v2505_v29, %v5193_v60 }
 0x1dc   :  { %v2507_v7 = vpop.f32.mrf.mxu2 }
 0x1e0   :  { %v2648_v43 = vpop.f32.mrf.mxu1 }
 0x1e4   :  { %v2557_v49 = vpop.f32.mrf.mxu2 }
 0x1e5   :  { %v2558_v60 = vadd.f32 %v2557_v49, %v5196_v13 }
 0x1e8   :  { %v2635_v39 = vpop.f32.mrf.mxu3  ;;  %v2650_v48 = vpop.f32.mrf.mxu1 }
 0x1e9   :  { %v2636_v40 = vadd.f32 %v2635_v39, %v1825_v32  ;;  %v4824_v32 = vld [vmem:[%s5221_s6] ss:$0 sm:$0xff] }
 0x1eb   :  { %v5203_v16 = vadd.f32 %v2648_v43, %v2636_v40 }
 0x1ec   :  { %v2559_v52 = vpop.f32.mrf.mxu2 }
 0x1f0   :  { %v2637_v28 = vpop.f32.mrf.mxu3 }
 0x1f2   :  { %v2518_v25 = vpop.f32.mrf.mxu0 }
 0x1f3   :  { %v2519_v54 = vadd.f32 %v2518_v25, %v2506_v53 }
 0x1f5   :  { %v2678_v30 = vmax.f32 %v2519_v54, 0.0 }
 0x1f6   :  { %v2609_v58 = vpop.f32.mrf.mxu2 }
 0x1f7   :  { %v2682_v59 = vpack.c.bf16 %v2678_v30, %v2678_v30  ;;  %v2610_v15 = vadd.f32 %v2609_v58, %v5200_v20 }
 0x1f9   :  { %2954 = vmatmul.bf16.vlgmr.msrb.gmra.mxu3 %v2682_v59 }
 0x1fa   :  { %v2520_v0 = vpop.f32.mrf.mxu0 }
 0x1fe   :  { %v2611_v3 = vpop.f32.mrf.mxu2 }
 0x202   :  { %v2570_v5 = vpop.f32.mrf.mxu0 }
 0x203   :  { %v2571_v46 = vadd.f32 %v2570_v5, %v2558_v60 }
 0x205   :  { %v2679_v8 = vmax.f32 %v2571_v46, 0.0 }
 0x207   :  { %v2683_v9 = vpack.c.bf16 %v2679_v8, %v2679_v8 }
 0x209   :  { %2967 = vmatmul.bf16.vlgmr.msrb.gmra.mxu1 %v2683_v9 }
 0x20a   :  { %v2572_v12 = vpop.f32.mrf.mxu0 }
 0x212   :  { %v2622_v45 = vpop.f32.mrf.mxu0 }
 0x213   :  { %v2623_v17 = vadd.f32 %v2622_v45, %v2610_v15 }
 0x215   :  { %v2680_v13 = vmax.f32 %v2623_v17, 0.0 }
 0x216   :  { %v2661_v62 = vpop.f32.mrf.mxu2 }
 0x217   :  { %v2684_v18 = vpack.c.bf16 %v2680_v13, %v2680_v13  ;;  %v2662_v22 = vadd.f32 %v2661_v62, %v5203_v16 }
 0x219   :  { %2980 = vmatmul.bf16.vlgmr.msrb.gmra.mxu2 %v2684_v18 }
 0x21a   :  { %v2624_v19 = vpop.f32.mrf.mxu0 }
 0x21e   :  { %v2663_v21 = vpop.f32.mrf.mxu2 }
 0x232   :  { %v2674_v23 = vpop.f32.mrf.mxu0 }
 0x233   :  { %v2675_v24 = vadd.f32 %v2674_v23, %v2662_v22 }
 0x235   :  { %v2681_v34 = vmax.f32 %v2675_v24, 0.0 }
 0x237   :  { %v2685_v26 = vpack.c.bf16 %v2681_v34, %v2681_v34 }
 0x239   :  { %2993 = vmatmul.bf16.vlgmr.msrb.gmra.mxu0 %v2685_v26 }
 0x23a   :  { %v2676_v27 = vpop.f32.mrf.mxu0 }
 0x27c   :  { %v2955_v51 = vpop.f32.mrf.mxu3 }
 0x27d   :  { %v2956_v33 = vadd.f32 %v4824_v32, %v2955_v51 }
 0x284   :  { %v2957_v20 = vpop.f32.mrf.mxu3 }
 0x286   :  { %v2968_v38 = vpop.f32.mrf.mxu1 }
 0x287   :  { %v2969_v36 = vadd.f32 %v2968_v38, %v2956_v33 }
 0x28e   :  { %v2970_v2 = vpop.f32.mrf.mxu1 }
 0x29c   :  { %v2981_v31 = vpop.f32.mrf.mxu2 }
 0x29d   :  { %v2982_v39 = vadd.f32 %v2981_v31, %v2969_v36 }
 0x2a4   :  { %v2983_v29 = vpop.f32.mrf.mxu2 }
 0x2b6   :  { %v2994_v40 = vpop.f32.mrf.mxu0 }
 0x2b7   :  { %v2995_v41 = vadd.f32 %v2994_v40, %v2982_v39 }
 0x2b9   :  { %2998 = vmax.xlane.f32.xlu0 %v2995_v41 }
 0x2be   :  { %v2996_v42 = vpop.f32.mrf.mxu0 }
 0x32c   :  { %v2999_v43 = vpop.xlane.xlu0 %2998 }
 0x32d   :  { %v3000_v7 = vsub.f32 %v2995_v41, %v2999_v43 }
 0x32f   :  { %v3001_v16 = vmul.f32 1.442695, %v3000_v7 }
 0x331   :  { %4825 = vpow2.f32 %v3001_v16 }
 0x337   :  { %v4826_v10 = vpop.eup %4825 }
 0x338   :  { %3003 = vadd.xlane.f32.xlu0 %v4826_v10 }
 0x3ab   :  { %v3004_v6 = vpop.xlane.xlu0 %3003 }
 0x3ac   :  { %4827 = vlog2.f32 %v3004_v6 }
 0x3b2   :  { %v4828_v28 = vpop.eup %4827 }
 0x3b3   :  { %v3006_v44 = vmul.f32 0.6931472, %v4828_v28 }
 0x3b5   :  { %v3007_v47 = vsub.f32 %v3000_v7, %v3006_v44 }
 0x3b7   :  { %3008 = vst [vmem:[#allocation13] sm:$0xff] %v3007_v47 }
 0x3b8   :  { %3019 = dma.vmem_to_hbm [thread:$0]  %s3015_s9, 128, %s3017_s11, [#allocation4]  }
 0x3b9   :  { %5005 = dma.done.wait [#allocation4], 128  }
 0x3ba   :  { %5006 = vsyncadd [#allocation4], 4294967168 }
 0x3bb   :  { %3024 = vsyncpa [#allocation3], 1 }
 0x3bc   :  { %3025 = vsyncpa [#allocation6], 1 }
 0x3bd   :  { %3026 = vsyncpa [#allocation9], 1 }
 0x3be   :  { %3027 = vsyncpa [#allocation12], 1 }
 0x3bf   :  { %3028 = vsyncpa [#allocation4], 1 }

</bundles_post_ra>
